<compile_context>
chip_gen: v5e
topology: v5e:2x2
jax: 0.10.0
libtpu: 0.0.40
codegen_flags: <defaults>
</compile_context>

<pallas_src>
import functools

import jax
import jax.numpy as jnp
from jax import lax
from jax.experimental import pallas as pl
from jax.experimental.pallas import tpu as pltpu

TN = 512                                    # points per tile (lane axis)
INIT_BONES = (0, 1, 2, 4, 5, 16, 17, 18, 19)
N_JOINTS = 24
HIDDEN = 64
MAX_VOXEL_CHUNK = 2048                      # V-axis chunk (review: <= 2048)


# ----------------------------------------------------------------------------
# glue helpers
# ----------------------------------------------------------------------------
def _round_up(n, m):
    return ((n + m - 1) // m) * m


def _vmem_limit_bytes():
    """Generation-aware VMEM limit: ~108 MiB on v5e/v6e, ~54 MiB on v7x."""
    try:
        cap = int(pltpu.get_tpu_info().vmem_capacity_bytes)
    except Exception:
        return 48 * 1024 * 1024
    return min(int(cap * 0.85), 110 * 1024 * 1024)


def create_voxel_grid(d, h, w):
    # TODO(synk): original create_voxel_grid denormalizes by a body bbox; we
    # use the canonical [-1,1]^3 grid so voxel build & grid_sample agree.
    zs = jnp.linspace(-1.0, 1.0, d)
    ys = jnp.linspace(-1.0, 1.0, h)
    xs = jnp.linspace(-1.0, 1.0, w)
    zg, yg, xg = jnp.meshgrid(zs, ys, xs, indexing="ij")
    pts = jnp.stack([xg, yg, zg], axis=-1).reshape(-1, 3)      # [d*h*w, 3]
    return pts.astype(jnp.float32)


def _transpose_mlp_params(p, pad_out_to=None):
    """Transpose MLP params for lane-dense (features x points) kernels.

    w1/w2 are stored bf16 (MXU operands, f32 accumulation); everything touched
    by the VPU stays f32.
    """
    w2_t = jnp.transpose(p["w2"]).astype(jnp.float32)           # [d_out, H]
    b2 = p["b2"].reshape(-1, 1).astype(jnp.float32)             # [d_out, 1]
    if pad_out_to is not None and w2_t.shape[0] < pad_out_to:
        extra = pad_out_to - w2_t.shape[0]
        w2_t = jnp.pad(w2_t, ((0, extra), (0, 0)))
        b2 = jnp.pad(b2, ((0, extra), (0, 0)))
    return (jnp.transpose(p["w0"]).astype(jnp.float32),
            p["b0"].reshape(-1, 1).astype(jnp.float32),
            jnp.transpose(p["w1"]).astype(jnp.bfloat16),
            p["b1"].reshape(-1, 1).astype(jnp.float32),
            w2_t.astype(jnp.bfloat16), b2)


# ----------------------------------------------------------------------------
# in-kernel math helpers (traced inside Pallas kernels; [rows, TN] layout)
# ----------------------------------------------------------------------------
def _softplus(x):
    return jnp.maximum(x, 0.0) + jnp.log(1.0 + jnp.exp(-jnp.abs(x)))


def _mlp_t(x3, w0, b0, w1, b1, w2, b2):
    """3-layer softplus MLP, transposed (features on sublanes, points on lanes).

    x3: [3, TN]; w0: [H, 3] f32; w1/w2: bf16 MXU operands (f32 accumulate).
    Layer 0 (K=3) is computed on the VPU as broadcast multiply-adds.
    """
    h = (w0[:, 0:1] * x3[0:1, :] + w0[:, 1:2] * x3[1:2, :]
         + w0[:, 2:3] * x3[2:3, :] + b0)
    h = _softplus(h)
    h = _softplus(jnp.dot(w1, h.astype(w1.dtype),
                          preferred_element_type=jnp.float32) + b1)
    return jnp.dot(w2, h.astype(w2.dtype),
                   preferred_element_type=jnp.float32) + b2


def _trilinear_t(xc3, voxel_ref, iota_c, D, H, W, chunk):
    """grid_sample(align_corners=True, padding_mode='zeros', bilinear).

    xc3: [3, TN] rows (x,y,z); voxel_ref: [n_chunks, J, chunk] ref with flat
    index v = z*H*W + y*W + x = chunk_idx*chunk + offset.  The one-hot
    selection is built per V-chunk (bounded VMEM; works at any resolution) and
    accumulated through chunked MXU matmuls.  Out-of-range corners are
    index-clamped with zeroed weight.  Returns skinning weights [J, TN].
    """
    n = xc3.shape[1]
    n_chunks = voxel_ref.shape[0]
    J = voxel_ref.shape[1]
    x = xc3[0:1, :]
    y = xc3[1:2, :]
    z = xc3[2:3, :]
    ix = (x + 1.0) * (0.5 * (W - 1))
    iy = (y + 1.0) * (0.5 * (H - 1))
    iz = (z + 1.0) * (0.5 * (D - 1))
    ix0f = jnp.floor(ix)
    iy0f = jnp.floor(iy)
    iz0f = jnp.floor(iz)
    fx = ix - ix0f
    fy = iy - iy0f
    fz = iz - iz0f
    ix0 = ix0f.astype(jnp.int32)
    iy0 = iy0f.astype(jnp.int32)
    iz0 = iz0f.astype(jnp.int32)

    corners = []
    for dz in (0, 1):
        cz = iz0 + dz
        wz = fz if dz else (1.0 - fz)
        vz = (cz >= 0) & (cz < D)
        czc = jnp.clip(cz, 0, D - 1)
        for dy in (0, 1):
            cy = iy0 + dy
            wy = fy if dy else (1.0 - fy)
            vy = (cy >= 0) & (cy < H)
            cyc = jnp.clip(cy, 0, H - 1)
            for dx in (0, 1):
                cx = ix0 + dx
                wx = fx if dx else (1.0 - fx)
                vx = (cx >= 0) & (cx < W)
                cxc = jnp.clip(cx, 0, W - 1)
                wgt = wz * wy * wx * (vz & vy & vx).astype(jnp.float32)
                idx = czc * (H * W) + cyc * W + cxc
                corners.append((idx, wgt))

    def one_chunk(ci, acc):
        base = ci * chunk
        sel = jnp.zeros((chunk, n), jnp.float32)
        for idx, wgt in corners:
            # compare against the (cheap) shifted [1,TN] index instead of
            # shifting the [chunk,TN] iota.
            sel = sel + jnp.where(iota_c == (idx - base), wgt, 0.0)
        return acc + jnp.dot(voxel_ref[ci], sel,
                             preferred_element_type=jnp.float32)

    acc0 = jnp.zeros((J, n), jnp.float32)
    if n_chunks <= 8:
        w_out = acc0
        for ci in range(n_chunks):
            w_out = one_chunk(ci, w_out)
    else:
        w_out = lax.fori_loop(0, n_chunks, one_chunk, acc0)
    return w_out


def _apply_blend(M, x3):
    """xd = (sum_j w_j T_j) @ [x;1].  M: [12, TN], rows ordered c*3+r."""
    return (M[0:3, :] * x3[0:1, :] + M[3:6, :] * x3[1:2, :]
            + M[6:9, :] * x3[2:3, :] + M[9:12, :])


def _inv3x3(M):
    """3x3 inverse of the blended linear part; a[r][c] = M[3*c+r].
    Returns [9, TN] rows ordered row-major i*3+j.  The approx reciprocal only
    seeds the Broyden Jacobian inverse and is self-corrected by the iteration.
    """
    a = [[M[3 * c + r:3 * c + r + 1, :] for c in range(3)] for r in range(3)]
    c00 = a[1][1] * a[2][2] - a[1][2] * a[2][1]
    c01 = a[1][0] * a[2][2] - a[1][2] * a[2][0]
    c02 = a[1][0] * a[2][1] - a[1][1] * a[2][0]
    det = a[0][0] * c00 - a[0][1] * c01 + a[0][2] * c02
    det = jnp.where(jnp.abs(det) < 1e-12,
                    jnp.where(det >= 0.0, 1e-12, -1e-12), det)   # NaN guard
    invdet = pl.reciprocal(det, approx=True)
    rows = [
        c00,
        -(a[0][1] * a[2][2] - a[0][2] * a[2][1]),
        a[0][1] * a[1][2] - a[0][2] * a[1][1],
        -c01,
        a[0][0] * a[2][2] - a[0][2] * a[2][0],
        -(a[0][0] * a[1][2] - a[0][2] * a[1][0]),
        c02,
        -(a[0][0] * a[2][1] - a[0][1] * a[2][0]),
        a[0][0] * a[1][1] - a[0][1] * a[1][0],
    ]
    return jnp.concatenate([r * invdet for r in rows], axis=0)


def _matvec3(m9, v3):
    rows = [m9[3 * i:3 * i + 1, :] * v3[0:1, :]
            + m9[3 * i + 1:3 * i + 2, :] * v3[1:2, :]
            + m9[3 * i + 2:3 * i + 3, :] * v3[2:3, :] for i in range(3)]
    return jnp.concatenate(rows, axis=0)


def _vecmat3(v3, m9):
    rows = [v3[0:1, :] * m9[j:j + 1, :] + v3[1:2, :] * m9[3 + j:4 + j, :]
            + v3[2:3, :] * m9[6 + j:7 + j, :] for j in range(3)]
    return jnp.concatenate(rows, axis=0)


def _norm3(v3):
    return jnp.sqrt(v3[0:1, :] ** 2 + v3[1:2, :] ** 2 + v3[2:3, :] ** 2)


# ----------------------------------------------------------------------------
# Kernel 1: mlp_to_voxel — lbs MLP over voxel grid + soft_blend softmax
# ----------------------------------------------------------------------------
def _lbs_voxel_kernel(x_ref, w0_ref, b0_ref, w1_ref, b1_ref, w2_ref, b2_ref,
                      o_ref, *, soft_blend):
    # TODO(synk): ImplicitNetwork source not provided; deterministic synthetic
    # 3-layer softplus MLP, `cond` conditioning ignored.
    out = _mlp_t(x_ref[...], w0_ref[...], b0_ref[...], w1_ref[...],
                 b1_ref[...], w2_ref[...], b2_ref[...])          # [J, G]
    out = out * soft_blend
    out = out - jnp.max(out, axis=0, keepdims=True)
    e = jnp.exp(out)
    # exact normalization so skinning weights sum to 1 (review correctness).
    o_ref[...] = e / jnp.sum(e, axis=0, keepdims=True)


def mlp_to_voxel(lbs_params_t, d, h, w, soft_blend, chunk, Vp):
    """Returns the voxel already in chunked layout [n_chunks, J, chunk]."""
    V = d * h * w
    n_chunks = Vp // chunk
    gp_t = jnp.transpose(create_voxel_grid(d, h, w))             # [3, V]
    gp_t = jnp.pad(gp_t, ((0, 0), (0, Vp - V)))
    kernel = functools.partial(_lbs_voxel_kernel, soft_blend=soft_blend)
    voxel = pl.pallas_call(
        kernel,
        out_shape=jax.ShapeDtypeStruct((n_chunks, N_JOINTS, chunk),
                                       jnp.float32),
        grid=(n_chunks,),
        in_specs=[pl.BlockSpec((3, chunk), lambda n: (0, n))] +
                 [pl.BlockSpec(p.shape, lambda n: (0, 0))
                  for p in lbs_params_t],
        out_specs=pl.BlockSpec((None, N_JOINTS, chunk), lambda n: (n, 0, 0)),
        compiler_params=pltpu.CompilerParams(
            dimension_semantics=("parallel",),
            vmem_limit_bytes=_vmem_limit_bytes()),
    )(gp_t, *lbs_params_t)
    return voxel                                                 # [C, J, VC]


# ----------------------------------------------------------------------------
# Kernel 2: fused __init + __search (Broyden) + __query_cano
# ----------------------------------------------------------------------------
def _search_kernel(xd_ref, inv_init_ref, tfs_t_ref, voxel_ref,
                   w0_ref, b0_ref, w1_ref, b1_ref, w2_ref, b2_ref,
                   out_ref, *, D, H, W, chunk, max_steps, cvg_thresh,
                   dvg_thresh, eps):
    xd3 = xd_ref[...]                                            # [3, TN]
    tfs_t = tfs_t_ref[...]                                       # [12, J]
    inv0 = inv_init_ref[...]                                     # [3, 4]
    n = xd3.shape[1]
    # base iota for V-chunks, built once and reused by every skin() call.
    iota_c = lax.broadcasted_iota(jnp.int32, (chunk, n), 0)

    # ---- __init: xc0 = inv(T_bone)[:3] @ [xd; 1]  (pure VPU broadcasts) ----
    x_in = xd3[0:1, :]
    y_in = xd3[1:2, :]
    z_in = xd3[2:3, :]
    rows = [inv0[r:r + 1, 0:1] * x_in + inv0[r:r + 1, 1:2] * y_in
            + inv0[r:r + 1, 2:3] * z_in + inv0[r:r + 1, 3:4]
            for r in range(3)]
    xc0 = jnp.concatenate(rows, axis=0)                          # [3, TN]

    def skin(xc3):
        w = _trilinear_t(xc3, voxel_ref, iota_c, D, H, W, chunk)  # [J, TN]
        # NOTE: tiny [12,J]@[J,TN] blend kept on the MXU (shares the unit with
        # the chunked selection matmul; FLOPs negligible).
        M = jnp.dot(tfs_t, w, preferred_element_type=jnp.float32)  # [12, TN]
        return _apply_blend(M, xc3), M

    # ---- initial residual + eval-mode J_inv_init (shares first weight query)
    xd0, M0 = skin(xc0)
    gx = xd0 - xd3
    j_inv = _inv3x3(M0)                                          # [9, TN]
    update = -_matvec3(j_inv, gx)
    x = xc0
    x_opt = xc0
    gx_norm_opt = _norm3(gx)
    ids_val = jnp.ones_like(gx_norm_opt, dtype=jnp.bool_)

    def body(_, carry):
        x, gx, j_inv, update, x_opt, gx_norm_opt, ids_val = carry
        delta_x = jnp.where(ids_val, update, 0.0)
        x = x + delta_x
        xd_new, _ = skin(x)
        delta_gx = jnp.where(ids_val, (xd_new - xd3) - gx, 0.0)
        gx = gx + delta_gx
        gx_norm = _norm3(gx)
        ids_opt = gx_norm < gx_norm_opt
        gx_norm_opt = jnp.where(ids_opt, gx_norm, gx_norm_opt)
        x_opt = jnp.where(ids_opt, x, x_opt)
        ids_val = (gx_norm_opt > cvg_thresh) & (gx_norm < dvg_thresh)
        vT = _vecmat3(delta_x, j_inv)                            # [3, TN]
        a = delta_x - _matvec3(j_inv, delta_gx)                  # [3, TN]
        b = (vT[0:1, :] * delta_gx[0:1, :] + vT[1:2, :] * delta_gx[1:2, :]
             + vT[2:3, :] * delta_gx[2:3, :])
        b = jnp.where(b >= 0.0, b + eps, b - eps)
        inv_b = 1.0 / b
        upd = jnp.concatenate(
            [a[i:i + 1, :] * vT[j:j + 1, :] * inv_b
             for i in range(3) for j in range(3)], axis=0)       # [9, TN]
        j_inv = jnp.where(ids_val, j_inv + upd, j_inv)
        update = -_matvec3(j_inv, gx)
        return (x, gx, j_inv, update, x_opt, gx_norm_opt, ids_val)

    carry = (x, gx, j_inv, update, x_opt, gx_norm_opt, ids_val)
    carry = lax.fori_loop(0, max_steps, body, carry, unroll=True)
    _, _, _, _, x_opt, gx_norm_opt, _ = carry

    # ---- __query_cano: disp_network(xc_opt) + xc_opt (fused) ---------------
    disp = _mlp_t(x_opt, w0_ref[...], b0_ref[...], w1_ref[...], b1_ref[...],
                  w2_ref[...], b2_ref[...])[0:3, :]              # [3, TN]
    valid = (gx_norm_opt < cvg_thresh).astype(jnp.float32)       # [1, TN]
    # single lane-dense [8, TN] output slab: xc(3) | xc_opt(3) | valid | pad
    out_ref[...] = jnp.concatenate(
        [disp + x_opt, x_opt, valid, jnp.zeros_like(valid)], axis=0)


# ----------------------------------------------------------------------------
# ForwardDeformer forward
# ----------------------------------------------------------------------------
def forward_deformer(xd, cond, tfs, params, opt, eval_mode=True, mask=None):
    """xd: [B, N, 3]; tfs: [B, J, 4, 4] -> (xc_full [B, N, I, 3], others)."""
    del cond  # TODO(synk): cond-conditioning needs ImplicitNetwork internals.
    if mask is not None:
        # TODO(synk): boolean compaction xd[mask] is data-dependent; only the
        # default all-valid mask is supported here.
        raise NotImplementedError
    if not eval_mode:
        # TODO(synk): training path needs the implicit-gradient correction
        # (torch.autograd.grad) through the skinning kernel.
        raise NotImplementedError

    B, N, _ = xd.shape
    J = tfs.shape[1]
    I = len(INIT_BONES)
    d, h, w = opt["res"] // opt["z_ratio"], opt["res"], opt["res"]
    V = d * h * w
    chunk = min(MAX_VOXEL_CHUNK, _round_up(V, 128))
    Vp = _round_up(V, chunk)

    # --- mlp_to_voxel: lbs MLP over the voxel grid + soft_blend softmax -----
    lbs_t = _transpose_mlp_params(params["lbs"])
    voxel_chunks = mlp_to_voxel(lbs_t, d, h, w, opt["soft_blend"], chunk, Vp)

    # --- tiny per-batch transform operands (no per-point replication) -------
    tfs_f = tfs.astype(jnp.float32)
    # blend operand: row index c*3+r holds tfs[b, j, r, c]        [B, 12, J]
    tfs_t = jnp.transpose(tfs_f[:, :, :3, :], (0, 3, 2, 1)).reshape(B, 12, J)
    # init operand: first 3 rows of inv(T) for the 9 init bones   [B, I, 3, 4]
    inv_init = jnp.linalg.inv(tfs_f[:, jnp.array(INIT_BONES)])[:, :, :3, :]

    # --- points, lane-dense (points on lanes) --------------------------------
    Np = _round_up(N, TN)
    xd_t = jnp.transpose(xd.astype(jnp.float32), (0, 2, 1))      # [B, 3, N]
    xd_t = jnp.pad(xd_t, ((0, 0), (0, 0), (0, Np - N)))

    disp_t = _transpose_mlp_params(params["disp"], pad_out_to=8)

    kernel = functools.partial(
        _search_kernel, D=d, H=h, W=w, chunk=chunk,
        max_steps=int(opt["max_steps"]),
        cvg_thresh=1e-5, dvg_thresh=1.0, eps=1e-6)
    n_tiles = Np // TN
    # grid order (B, n_tiles, I): init-bone axis innermost so the xd tile and
    # all constant operands (voxel, tfs, MLP params) are not re-DMA'd per bone.
    out = pl.pallas_call(
        kernel,
        out_shape=jax.ShapeDtypeStruct((B, I, 8, Np), jnp.float32),
        grid=(B, n_tiles, I),
        in_specs=[pl.BlockSpec((None, 3, TN), lambda b, n, i: (b, 0, n)),
                  pl.BlockSpec((None, None, 3, 4),
                               lambda b, n, i: (b, i, 0, 0)),
                  pl.BlockSpec((None, 12, J), lambda b, n, i: (b, 0, 0)),
                  pl.BlockSpec(voxel_chunks.shape,
                               lambda b, n, i: (0, 0, 0))]
                 + [pl.BlockSpec(p.shape, lambda b, n, i: (0, 0))
                    for p in disp_t],
        out_specs=pl.BlockSpec((None, None, 8, TN),
                               lambda b, n, i: (b, i, 0, n)),
        compiler_params=pltpu.CompilerParams(
            dimension_semantics=("parallel", "parallel", "parallel"),
            vmem_limit_bytes=_vmem_limit_bytes()),
    )(xd_t, inv_init, tfs_t, voxel_chunks, *disp_t)

    xc_full = jnp.transpose(out[:, :, 0:3, :N], (0, 3, 1, 2))    # [B, N, I, 3]
    xc_opt = jnp.transpose(out[:, :, 3:6, :N], (0, 3, 1, 2))     # [B, N, I, 3]
    valid = jnp.transpose(out[:, :, 6, :N], (0, 2, 1)) > 0.5     # [B, N, I]
    others = {"valid_ids": valid, "result": xc_opt}
    return xc_full, others


# ----------------------------------------------------------------------------
# deterministic synthetic parameters
# ----------------------------------------------------------------------------
def init_params(key):
    def mlp_params(k, d_in, d_out, scale_last=1.0):
        k0, k1, k2 = jax.random.split(k, 3)
        return {
            "w0": (jax.random.normal(k0, (d_in, HIDDEN)) / jnp.sqrt(float(d_in))
                   ).astype(jnp.float32),
            "b0": jnp.zeros((HIDDEN,), jnp.float32),
            "w1": (jax.random.normal(k1, (HIDDEN, HIDDEN))
                   / jnp.sqrt(float(HIDDEN))).astype(jnp.float32),
            "b1": jnp.zeros((HIDDEN,), jnp.float32),
            "w2": (scale_last * jax.random.normal(k2, (HIDDEN, d_out))
                   / jnp.sqrt(float(HIDDEN))).astype(jnp.float32),
            "b2": jnp.zeros((d_out,), jnp.float32),
        }

    klbs, kdisp = jax.random.split(key)
    return {"lbs": mlp_params(klbs, 3, N_JOINTS),
            "disp": mlp_params(kdisp, 3, 3, scale_last=0.1)}


# ----------------------------------------------------------------------------
# main
# ----------------------------------------------------------------------------
if __name__ == "__main__":
    key = jax.random.PRNGKey(0)
    B, N = 2, 8
    opt = dict(res=8, z_ratio=2, soft_blend=20.0, align_corners=True,
               max_steps=5)

    k1, k2, k3, kp = jax.random.split(key, 4)
    xd = jax.random.uniform(k1, (B, N, 3), minval=-0.5, maxval=0.5,
                            dtype=jnp.float32)

    # near-identity rigid-ish bone transforms, last row [0, 0, 0, 1]
    rot = jnp.eye(3, dtype=jnp.float32) + 0.05 * jax.random.normal(
        k2, (B, N_JOINTS, 3, 3), dtype=jnp.float32)
    trans = 0.1 * jax.random.normal(k3, (B, N_JOINTS, 3, 1), dtype=jnp.float32)
    top = jnp.concatenate([rot, trans], axis=-1)
    bottom = jnp.broadcast_to(
        jnp.array([[0.0, 0.0, 0.0, 1.0]], jnp.float32), (B, N_JOINTS, 1, 4))
    tfs = jnp.concatenate([top, bottom], axis=-2)                # [B, J, 4, 4]

    params = init_params(kp)
    xc_full, others = forward_deformer(xd, {}, tfs, params, opt,
                                       eval_mode=True)
    jax.block_until_ready(xc_full)
    jax.block_until_ready(others["valid_ids"])

    assert xc_full.shape == (B, N, len(INIT_BONES), 3)
    assert others["valid_ids"].shape == (B, N, len(INIT_BONES))
    assert others["result"].shape == (B, N, len(INIT_BONES), 3)
    assert bool(jnp.all(jnp.isfinite(xc_full)))
    print("KERNEL_OK")
</pallas_src>

<mosaic_0001>
module attributes {stable_mosaic.version = 11 : i64} {
  func.func @_lbs_voxel_kernel(%arg0: i32, %arg1: memref<3x256xf32, #tpu.memory_space<vmem>>, %arg2: memref<64x3xf32, #tpu.memory_space<vmem>>, %arg3: memref<64x1xf32, #tpu.memory_space<vmem>>, %arg4: memref<64x64xbf16, #tpu.memory_space<vmem>>, %arg5: memref<64x1xf32, #tpu.memory_space<vmem>>, %arg6: memref<24x64xbf16, #tpu.memory_space<vmem>>, %arg7: memref<24x1xf32, #tpu.memory_space<vmem>>, %arg8: memref<1x24x256xf32, #tpu.memory_space<vmem>>) attributes {dimension_semantics = [#tpu.dimension_semantics<parallel>], iteration_bounds = array<i64: 1>, scalar_prefetch = 0 : i64, scratch_operands = 0 : i64, tpu.core_type = #tpu.core_type<tc>, window_params = [{transform_indices = @transform_0, window_bounds = array<i64: 3, 256>}, {pipeline_mode = #tpu.pipeline_mode<synchronous>, transform_indices = @transform_1, window_bounds = array<i64: 64, 3>}, {pipeline_mode = #tpu.pipeline_mode<synchronous>, transform_indices = @transform_2, window_bounds = array<i64: 64, 1>}, {pipeline_mode = #tpu.pipeline_mode<synchronous>, transform_indices = @transform_3, window_bounds = array<i64: 64, 64>}, {pipeline_mode = #tpu.pipeline_mode<synchronous>, transform_indices = @transform_4, window_bounds = array<i64: 64, 1>}, {pipeline_mode = #tpu.pipeline_mode<synchronous>, transform_indices = @transform_5, window_bounds = array<i64: 24, 64>}, {pipeline_mode = #tpu.pipeline_mode<synchronous>, transform_indices = @transform_6, window_bounds = array<i64: 24, 1>}, {transform_indices = @transform_7, window_bounds = array<i64: 1, 24, 256>}]} {
    %c0 = arith.constant 0 : index
    %c0_0 = arith.constant 0 : index
    %0 = vector.load %arg1[%c0, %c0_0] : memref<3x256xf32, #tpu.memory_space<vmem>>, vector<3x256xf32>
    %c0_1 = arith.constant 0 : index
    %c0_2 = arith.constant 0 : index
    %1 = vector.load %arg2[%c0_1, %c0_2] : memref<64x3xf32, #tpu.memory_space<vmem>>, vector<64x3xf32>
    %c0_3 = arith.constant 0 : index
    %c0_4 = arith.constant 0 : index
    %2 = vector.load %arg3[%c0_3, %c0_4] : memref<64x1xf32, #tpu.memory_space<vmem>>, vector<64x1xf32>
    %c0_5 = arith.constant 0 : index
    %c0_6 = arith.constant 0 : index
    %3 = vector.load %arg4[%c0_5, %c0_6] : memref<64x64xbf16, #tpu.memory_space<vmem>>, vector<64x64xbf16>
    %c0_7 = arith.constant 0 : index
    %c0_8 = arith.constant 0 : index
    %4 = vector.load %arg5[%c0_7, %c0_8] : memref<64x1xf32, #tpu.memory_space<vmem>>, vector<64x1xf32>
    %c0_9 = arith.constant 0 : index
    %c0_10 = arith.constant 0 : index
    %5 = vector.load %arg6[%c0_9, %c0_10] : memref<24x64xbf16, #tpu.memory_space<vmem>>, vector<24x64xbf16>
    %c0_11 = arith.constant 0 : index
    %c0_12 = arith.constant 0 : index
    %6 = vector.load %arg7[%c0_11, %c0_12] : memref<24x1xf32, #tpu.memory_space<vmem>>, vector<24x1xf32>
    %7 = vector.extract_strided_slice %1 {offsets = [0, 0], sizes = [64, 1], strides = [1, 1]} : vector<64x3xf32> to vector<64x1xf32>
    %8 = vector.extract_strided_slice %0 {offsets = [0, 0], sizes = [1, 256], strides = [1, 1]} : vector<3x256xf32> to vector<1x256xf32>
    %9 = vector.broadcast %7 : vector<64x1xf32> to vector<64x256xf32>
    %10 = vector.broadcast %8 : vector<1x256xf32> to vector<64x256xf32>
    %11 = arith.mulf %9, %10 : vector<64x256xf32>
    %12 = vector.extract_strided_slice %1 {offsets = [0, 1], sizes = [64, 1], strides = [1, 1]} : vector<64x3xf32> to vector<64x1xf32>
    %13 = vector.extract_strided_slice %0 {offsets = [1, 0], sizes = [1, 256], strides = [1, 1]} : vector<3x256xf32> to vector<1x256xf32>
    %14 = vector.broadcast %12 : vector<64x1xf32> to vector<64x256xf32>
    %15 = vector.broadcast %13 : vector<1x256xf32> to vector<64x256xf32>
    %16 = arith.mulf %14, %15 : vector<64x256xf32>
    %17 = arith.addf %11, %16 : vector<64x256xf32>
    %18 = vector.extract_strided_slice %1 {offsets = [0, 2], sizes = [64, 1], strides = [1, 1]} : vector<64x3xf32> to vector<64x1xf32>
    %19 = vector.extract_strided_slice %0 {offsets = [2, 0], sizes = [1, 256], strides = [1, 1]} : vector<3x256xf32> to vector<1x256xf32>
    %20 = vector.broadcast %18 : vector<64x1xf32> to vector<64x256xf32>
    %21 = vector.broadcast %19 : vector<1x256xf32> to vector<64x256xf32>
    %22 = arith.mulf %20, %21 : vector<64x256xf32>
    %23 = arith.addf %17, %22 : vector<64x256xf32>
    %24 = vector.broadcast %2 : vector<64x1xf32> to vector<64x256xf32>
    %25 = arith.addf %23, %24 : vector<64x256xf32>
    %cst = arith.constant 0.000000e+00 : f32
    %26 = vector.broadcast %cst : f32 to vector<64x256xf32>
    %27 = arith.maximumf %25, %26 : vector<64x256xf32>
    %28 = math.absf %25 : vector<64x256xf32>
    %cst_13 = arith.constant 0.000000e+00 : f32
    %29 = vector.broadcast %cst_13 : f32 to vector<64x256xf32>
    %30 = arith.subf %29, %28 : vector<64x256xf32>
    %31 = math.exp %30 : vector<64x256xf32>
    %cst_14 = arith.constant 1.000000e+00 : f32
    %32 = vector.broadcast %cst_14 : f32 to vector<64x256xf32>
    %33 = arith.addf %32, %31 : vector<64x256xf32>
    %34 = math.log %33 : vector<64x256xf32>
    %35 = arith.addf %27, %34 : vector<64x256xf32>
    %36 = arith.truncf %35 : vector<64x256xf32> to vector<64x256xbf16>
    %cst_15 = arith.constant dense<0.000000e+00> : vector<64x256xf32>
    %37 = tpu.matmul %3, %36, %cst_15 {dimension_numbers = #tpu.dot_dimension_numbers<[1], [0], [0], [1], [0, 0, 1, 1], [], []>} : vector<64x64xbf16>, vector<64x256xbf16>, vector<64x256xf32> -> vector<64x256xf32>
    %38 = vector.broadcast %4 : vector<64x1xf32> to vector<64x256xf32>
    %39 = arith.addf %37, %38 : vector<64x256xf32>
    %cst_16 = arith.constant 0.000000e+00 : f32
    %40 = vector.broadcast %cst_16 : f32 to vector<64x256xf32>
    %41 = arith.maximumf %39, %40 : vector<64x256xf32>
    %42 = math.absf %39 : vector<64x256xf32>
    %cst_17 = arith.constant 0.000000e+00 : f32
    %43 = vector.broadcast %cst_17 : f32 to vector<64x256xf32>
    %44 = arith.subf %43, %42 : vector<64x256xf32>
    %45 = math.exp %44 : vector<64x256xf32>
    %cst_18 = arith.constant 1.000000e+00 : f32
    %46 = vector.broadcast %cst_18 : f32 to vector<64x256xf32>
    %47 = arith.addf %46, %45 : vector<64x256xf32>
    %48 = math.log %47 : vector<64x256xf32>
    %49 = arith.addf %41, %48 : vector<64x256xf32>
    %50 = arith.truncf %49 : vector<64x256xf32> to vector<64x256xbf16>
    %cst_19 = arith.constant dense<0.000000e+00> : vector<24x256xf32>
    %51 = tpu.matmul %5, %50, %cst_19 {dimension_numbers = #tpu.dot_dimension_numbers<[1], [0], [0], [1], [0, 0, 1, 1], [], []>} : vector<24x64xbf16>, vector<64x256xbf16>, vector<24x256xf32> -> vector<24x256xf32>
    %52 = vector.broadcast %6 : vector<24x1xf32> to vector<24x256xf32>
    %53 = arith.addf %51, %52 : vector<24x256xf32>
    %cst_20 = arith.constant 2.000000e+01 : f32
    %54 = vector.broadcast %cst_20 : f32 to vector<24x256xf32>
    %55 = arith.mulf %53, %54 : vector<24x256xf32>
    %cst_21 = arith.constant dense<0xFF800000> : vector<256xf32>
    %56 = vector.multi_reduction <maximumf>, %55, %cst_21 [0] : vector<24x256xf32> to vector<256xf32>
    %57 = vector.shape_cast %56 : vector<256xf32> to vector<1x256xf32>
    %58 = vector.broadcast %57 : vector<1x256xf32> to vector<24x256xf32>
    %59 = arith.subf %55, %58 : vector<24x256xf32>
    %60 = math.exp %59 : vector<24x256xf32>
    %cst_22 = arith.constant dense<0.000000e+00> : vector<256xf32>
    %61 = vector.multi_reduction <add>, %60, %cst_22 [0] : vector<24x256xf32> to vector<256xf32>
    %62 = vector.shape_cast %61 : vector<256xf32> to vector<1x256xf32>
    %63 = vector.broadcast %62 : vector<1x256xf32> to vector<24x256xf32>
    %64 = arith.divf %60, %63 : vector<24x256xf32>
    %c0_23 = arith.constant 0 : index
    %c0_24 = arith.constant 0 : index
    %c0_25 = arith.constant 0 : index
    %65 = vector.load %arg8[%c0_23, %c0_24, %c0_25] : memref<1x24x256xf32, #tpu.memory_space<vmem>>, vector<1x24x256xf32>
    %66 = vector.shape_cast %65 : vector<1x24x256xf32> to vector<24x256xf32>
    %67 = vector.shape_cast %64 : vector<24x256xf32> to vector<1x24x256xf32>
    tpu.vector_store %arg8[%c0_23, %c0_24, %c0_25], %67 {strides = array<i32>} : memref<1x24x256xf32, #tpu.memory_space<vmem>>, vector<1x24x256xf32>,
    return
  }
  func.func @transform_0(%arg0: i32) -> (i32, i32) {
    %c0_i32 = arith.constant 0 : i32
    %c0_i32_0 = arith.constant 0 : i32
    return %c0_i32, %arg0 : i32, i32
  }
  func.func @transform_1(%arg0: i32) -> (i32, i32) {
    %c0_i32 = arith.constant 0 : i32
    %c0_i32_0 = arith.constant 0 : i32
    %c0_i32_1 = arith.constant 0 : i32
    return %c0_i32, %c0_i32_0 : i32, i32
  }
  func.func @transform_2(%arg0: i32) -> (i32, i32) {
    %c0_i32 = arith.constant 0 : i32
    %c0_i32_0 = arith.constant 0 : i32
    %c0_i32_1 = arith.constant 0 : i32
    return %c0_i32, %c0_i32_0 : i32, i32
  }
  func.func @transform_3(%arg0: i32) -> (i32, i32) {
    %c0_i32 = arith.constant 0 : i32
    %c0_i32_0 = arith.constant 0 : i32
    %c0_i32_1 = arith.constant 0 : i32
    return %c0_i32, %c0_i32_0 : i32, i32
  }
  func.func @transform_4(%arg0: i32) -> (i32, i32) {
    %c0_i32 = arith.constant 0 : i32
    %c0_i32_0 = arith.constant 0 : i32
    %c0_i32_1 = arith.constant 0 : i32
    return %c0_i32, %c0_i32_0 : i32, i32
  }
  func.func @transform_5(%arg0: i32) -> (i32, i32) {
    %c0_i32 = arith.constant 0 : i32
    %c0_i32_0 = arith.constant 0 : i32
    %c0_i32_1 = arith.constant 0 : i32
    return %c0_i32, %c0_i32_0 : i32, i32
  }
  func.func @transform_6(%arg0: i32) -> (i32, i32) {
    %c0_i32 = arith.constant 0 : i32
    %c0_i32_0 = arith.constant 0 : i32
    %c0_i32_1 = arith.constant 0 : i32
    return %c0_i32, %c0_i32_0 : i32, i32
  }
  func.func @transform_7(%arg0: i32) -> (i32, i32, i32) {
    %c0_i32 = arith.constant 0 : i32
    %c0_i32_0 = arith.constant 0 : i32
    %c0_i32_1 = arith.constant 0 : i32
    return %arg0, %c0_i32, %c0_i32_0 : i32, i32, i32
  }
}

</mosaic_0001>

<bundles_post_ra>
// kernel: tpu_custom_call.1
= control target key start
LH: loop header
LB: loop body
LE: loop exit
PB: predicated region body
PF: predicated region fallthrough
CT: control target
= control target key end

     0   :  { %v1182_v2 = vmov 2   ;;  %v1183_v3 = vmov 1   ;;  %s1580_s0 = inlined_call_operand.vmem [shape: f32[3,256], index: 0, kind: input, shape index: {}]   ;;  %s1581_s1 = inlined_call_operand.vmem [shape: f32[64,3], index: 1, kind: input, shape index: {}]   ;;  %s1582_s2 = inlined_call_operand.vmem [shape: f32[64,1], index: 2, kind: input, shape index: {}]   ;;  %s1583_s3 = inlined_call_operand.vmem [shape: bf16[64,64], index: 3, kind: input, shape index: {}]   ;;  %s1584_s4 = inlined_call_operand.vmem [shape: f32[64,1], index: 4, kind: input, shape index: {}]   ;;  %s1585_s5 = inlined_call_operand.vmem [shape: bf16[24,64], index: 5, kind: input, shape index: {}]   ;;  %s1586_s6 = inlined_call_operand.vmem [shape: f32[24,1], index: 6, kind: input, shape index: {}]   ;;  %s1587_s7 = inlined_call_operand.hbm [shape: f32[1,24,256], index: 7, kind: output, shape index: {}]  }
   0x1   :  { %v35_v0 = vld [vmem:[%s1581_s1 + $0x30] sm:$0xff]  ;;  %v32_v1 = vld [vmem:[%s1581_s1 + $0x18] sm:$0xff]  ;;  %1002 = vset.pattern.permute.xlu0 %v1182_v2  ;;  %992 = vset.pattern.permute.xlu2 %v1182_v2 }
   0x2   :  { %991 = vset.pattern.permute.xlu1 %v1183_v3  ;;  %225 = vperm.xlu2 %992, %v35_v0  }
   0x3   :  { %12 = vsyncpa [#allocation3], 0  ;;  %155 = vperm.xlu1 %991, %v35_v0   ;;  %213 = vperm.xlu0 %1002, %v32_v1   ;;  %v36_v4 = vld [vmem:[%s1581_s1 + $0x38] sm:$0xff]  ;;  %v34_v5 = vld [vmem:[%s1581_s1 + $0x28] sm:$0xff]  ;;  %v1184_v8 = vmov 0   ;;  %vm538_vm0 = vcmask 523264  }
   0x4   :  { %v33_v6 = vld [vmem:[%s1581_s1 + $0x20] sm:$0xff]  ;;  %v43_v9 = vld [vmem:[%s1582_s2 + $0x30] sm:$0xff]  ;;  %v44_v10 = vld [vmem:[%s1582_s2 + $0x38] sm:$0xff]  ;;  %s928_s19 = sshll.u32 %s1587_s7, 4  ;;  %s1186_s20 = smov 256   ;;  %s929_s19 = int_to_ptr.hbm [resolvable:$true] %s928_s19 }
   0x5   :  { %v29_v7 = vld [vmem:[%s1581_s1] sm:$0xff]  ;;  %v31_v11 = vld [vmem:[%s1581_s1 + $0x10] sm:$0xff]  ;;  %v40_v12 = vld [vmem:[%s1582_s2 + $0x18] sm:$0xff] }
   0x6   :  { %v41_v13 = vld [vmem:[%s1582_s2 + $0x20] sm:$0xff]  ;;  %v42_v14 = vld [vmem:[%s1582_s2 + $0x28] sm:$0xff]  ;;  %v56_v17 = vld [vmem:[%s1584_s4 + $0x18] sm:$0xff] }
   0x7   :  { %v57_v15 = vld [vmem:[%s1584_s4 + $0x20] sm:$0xff]  ;;  %v30_v16 = vld [vmem:[%s1581_s1 + $0x8] sm:$0xff]  ;;  %v39_v19 = vld [vmem:[%s1582_s2 + $0x10] sm:$0xff] }
   0x8   :  { %v64_v18 = vld [vmem:[%s1586_s6] sm:$0xff]  ;;  %v38_v22 = vld [vmem:[%s1582_s2 + $0x8] sm:$0xff]  ;;  %v59_v24 = vld [vmem:[%s1584_s4 + $0x30] sm:$0xff] }
   0x9   :  { %v37_v21 = vld [vmem:[%s1582_s2] sm:$0xff]  ;;  %v60_v25 = vld [vmem:[%s1584_s4 + $0x38] sm:$0xff]  ;;  %v58_v27 = vld [vmem:[%s1584_s4 + $0x28] sm:$0xff]  ;;  %s1187_s2 = smov 16  }
   0xa   :  { %229 = vperm.xlu2 %992, %v36_v4   ;;  %v55_v28 = vld [vmem:[%s1584_s4 + $0x10] sm:$0xff]  ;;  %v53_v32 = vld [vmem:[%s1584_s4] sm:$0xff]  ;;  %v54_v33 = vld [vmem:[%s1584_s4 + $0x8] sm:$0xff] }
   0xb   :  { %159 = vperm.xlu1 %991, %v36_v4   ;;  %1003 = vset.pattern.permute.xlu0 %v1183_v3  ;;  %v66_v36 = vld [vmem:[%s1586_s6 + $0x10] sm:$0xff]  ;;  %v65_v38 = vld [vmem:[%s1586_s6 + $0x8] sm:$0xff]  ;;  %v28_v39 = vld [vmem:[%s1580_s0] sm:$0x77] }
   0xc   :  { %151 = vperm.xlu0 %1003, %v34_v5   ;;  %v162_v42 = vperm.slane %v28_v39, 1  ;;  %v163_v43 = vperm.slane %v28_v39, 5  ;;  %v108_v45 = vperm.slane %v28_v39, 0  ;;  %v109_v46 = vperm.slane %v28_v39, 4 }
   0xd   :  { %v232_v47 = vperm.slane %v28_v39, 2  ;;  %v233_v48 = vperm.slane %v28_v39, 6 }
   0xe   :  { %v1331_v49 = vperm.slane %v162_v42, 1  ;;  %v1333_v50 = vperm.slane %v163_v43, 1  ;;  %v1335_v51 = vperm.slane %v108_v45, 0  ;;  %v1337_v52 = vperm.slane %v109_v46, 0 }
   0xf   :  { %v1341_v54 = vperm.slane %v232_v47, 2  ;;  %v1343_v55 = vperm.slane %v233_v48, 2 }
  0x12   :  { %994 = vset.pattern.permute.xlu2 %v1183_v3 }
  0x13   :  { %993 = vset.pattern.permute.xlu1 %v1184_v8  ;;  %147 = vperm.xlu2 %994, %v33_v6  }
  0x14   :  { %94 = vperm.xlu1 %993, %v34_v5   ;;  %131 = vperm.xlu0 %1003, %v29_v7  }
  0x1b   :  { %996 = vset.pattern.permute.xlu2 %v1182_v2 }
  0x1c   :  { %995 = vset.pattern.permute.xlu1 %v1182_v2  ;;  %1006 = vset.pattern.permute.xlu0 %v1184_v8 }
  0x1d   :  { %217 = vperm.xlu1 %995, %v33_v6   ;;  %221 = vperm.xlu2 %996, %v34_v5  }
  0x1e   :  { %99 = vperm.xlu0 %1006, %v35_v0  }
  0x25   :  { %997 = vset.pattern.permute.xlu1 %v1184_v8  ;;  %998 = vset.pattern.permute.xlu2 %v1184_v8 }
  0x26   :  { %104 = vperm.xlu0 %1006, %v36_v4   ;;  %302 = vperm.xlu1 %997, %v43_v9  }
  0x27   :  { %307 = vperm.xlu2 %998, %v44_v10  }
  0x2e   :  { %89 = vperm.xlu0 %1006, %v33_v6   ;;  %84 = vperm.xlu1 %997, %v32_v1  }
  0x2f   :  { %999 = vset.pattern.permute.xlu2 %v1183_v3 }
  0x30   :  { %139 = vperm.xlu2 %999, %v31_v11  }
  0x36   :  { %79 = vperm.xlu0 %1006, %v31_v11   ;;  %1000 = vset.pattern.permute.xlu1 %v1183_v3 }
  0x37   :  { %143 = vperm.xlu1 %1000, %v32_v1  }
  0x38   :  { %1001 = vset.pattern.permute.xlu2 %v1182_v2 }
  0x39   :  { %209 = vperm.xlu2 %1001, %v31_v11  }
  0x3e   :  { %287 = vperm.xlu0 %1006, %v40_v12  }
  0x3f   :  { %1004 = vset.pattern.permute.xlu1 %v1184_v8 }
  0x40   :  { %292 = vperm.xlu1 %1004, %v41_v13  }
  0x41   :  { %1005 = vset.pattern.permute.xlu2 %v1184_v8 }
  0x42   :  { %297 = vperm.xlu2 %1005, %v42_v14  }
  0x46   :  { %500 = vperm.xlu0 %1006, %v57_v15  }
  0x48   :  { %69 = vperm.xlu1 %1004, %v29_v7  }
  0x4a   :  { %74 = vperm.xlu2 %1005, %v30_v16  }
  0x4e   :  { %495 = vperm.xlu0 %1006, %v56_v17  }
  0x50   :  { %1007 = vset.pattern.permute.xlu1 %v1183_v3 }
  0x51   :  { %135 = vperm.xlu1 %1007, %v30_v16  }
  0x52   :  { %1008 = vset.pattern.permute.xlu2 %v1182_v2 }
  0x53   :  { %201 = vperm.xlu2 %1008, %v29_v7  }
  0x56   :  { %763 = vperm.xlu0 %1006, %v64_v18  }
  0x59   :  { %1009 = vset.pattern.permute.xlu1 %v1182_v2 }
  0x5a   :  { %205 = vperm.xlu1 %1009, %v30_v16  }
  0x5b   :  { %1010 = vset.pattern.permute.xlu2 %v1184_v8 }
  0x5c   :  { %282 = vperm.xlu2 %1010, %v39_v19   ;;  %v226_v20 = vpop.permute.xlu2 %225 }
  0x5d   :  { %v250_v2 = vmul.f32 %v1341_v54, %v226_v20  ;;  %v251_v3 = vmul.f32 %v1343_v55, %v226_v20 }
  0x62   :  { %1011 = vset.pattern.permute.xlu1 %v1184_v8 }
  0x63   :  { %272 = vperm.xlu1 %1011, %v37_v21  }
  0x64   :  { %277 = vperm.xlu2 %1010, %v38_v22   ;;  %v1292_v23 = vpop.permute.xlu2 %229 }
  0x65   :  { %v252_v18 = vmul.f32 %v1341_v54, %v1292_v23  ;;  %v253_v19 = vmul.f32 %v1343_v55, %v1292_v23 }
  0x6b   :  { %510 = vperm.xlu1 %1011, %v59_v24  }
  0x6c   :  { %515 = vperm.xlu2 %1010, %v60_v25  }
  0x6d   :  { %v1300_v26 = vpop.permute.xlu2 %147 }
  0x73   :  { %505 = vperm.xlu1 %1011, %v58_v27  }
  0x74   :  { %490 = vperm.xlu2 %1010, %v55_v28  }
  0x75   :  { %v156_v29 = vpop.permute.xlu1 %155  ;;  %v1308_v30 = vpop.permute.xlu0 %213 }
  0x76   :  { %v180_v57 = vmul.f32 %v1331_v49, %v156_v29  ;;  %v181_v58 = vmul.f32 %v1333_v50, %v156_v29 }
  0x77   :  { %v222_v31 = vpop.permute.xlu2 %221 }
  0x78   :  { %v248_v8 = vmul.f32 %v1341_v54, %v222_v31  ;;  %v249_v20 = vmul.f32 %v1343_v55, %v222_v31 }
  0x7b   :  { %480 = vperm.xlu1 %1011, %v53_v32  }
  0x7c   :  { %485 = vperm.xlu2 %1010, %v54_v33  }
  0x7d   :  { %v160_v34 = vpop.permute.xlu1 %159 }
  0x7e   :  { %v152_v35 = vpop.permute.xlu0 %151  ;;  %v182_v9 = vmul.f32 %v1331_v49, %v160_v34  ;;  %v183_v10 = vmul.f32 %v1333_v50, %v160_v34 }
  0x7f   :  { %v178_v0 = vmul.f32 %v1331_v49, %v152_v35  ;;  %v179_v4 = vmul.f32 %v1333_v50, %v152_v35 }
  0x81   :  { %v1319_v37 = vpop.permute.xlu2 %307 }
  0x83   :  { %773 = vperm.xlu1 %1011, %v66_v36  }
  0x84   :  { %768 = vperm.xlu2 %1010, %v65_v38  }
  0x86   :  { %v95_v40 = vpop.permute.xlu1 %94  ;;  %v1327_v41 = vpop.permute.xlu0 %131 }
  0x87   :  { %v124_v1 = vmul.f32 %v1335_v51, %v95_v40  ;;  %v125_v5 = vmul.f32 %v1337_v52, %v95_v40 }
  0x89   :  { %v194_v11 = vadd.f32 %v178_v0, %v124_v1  ;;  %v195_v21 = vadd.f32 %v179_v4, %v125_v5 }
  0x8a   :  { %v1329_v44 = vpop.permute.xlu2 %139 }
  0x8b   :  { %v264_v33 = vadd.f32 %v248_v8, %v194_v11  ;;  %v265_v36 = vadd.f32 %v249_v20, %v195_v21  ;;  %v245_v11 = vmul.f32 %v1343_v55, %v1308_v30  ;;  %v172_v20 = vmul.f32 %v1331_v49, %v1329_v44 }
  0x8c   :  { %v173_v21 = vmul.f32 %v1333_v50, %v1329_v44 }
  0x8f   :  { %v1339_v53 = vpop.permute.xlu1 %217 }
  0x90   :  { %v100_v56 = vpop.permute.xlu0 %99 }
  0x91   :  { %v126_v59 = vmul.f32 %v1335_v51, %v100_v56  ;;  %v127_v60 = vmul.f32 %v1337_v52, %v100_v56 }
  0x93   :  { %v196_v61 = vadd.f32 %v180_v57, %v126_v59  ;;  %v197_v62 = vadd.f32 %v181_v58, %v127_v60  ;;  %v1349_v63 = vpop.permute.xlu2 %209 }
  0x94   :  { %v242_v44 = vmul.f32 %v1341_v54, %v1349_v63 }
  0x95   :  { %v266_v6 = vadd.f32 %v250_v2, %v196_v61  ;;  %v267_v7 = vadd.f32 %v251_v3, %v197_v62  ;;  %v176_v61 = vmul.f32 %v1331_v49, %v1300_v26  ;;  %v177_v62 = vmul.f32 %v1333_v50, %v1300_v26 }
  0x96   :  { %v244_v26 = vmul.f32 %v1341_v54, %v1308_v30 }
  0x98   :  { %v105_v12 = vpop.permute.xlu0 %104  ;;  %v303_v13 = vpop.permute.xlu1 %302 }
  0x99   :  { %v128_v14 = vmul.f32 %v1335_v51, %v105_v12  ;;  %v129_v15 = vmul.f32 %v1337_v52, %v105_v12  ;;  %v1362_v16 = vadd.f32 %v303_v13, %v266_v6  ;;  %v1364_v17 = vadd.f32 %v303_v13, %v267_v7 }
  0x9b   :  { %v198_v22 = vadd.f32 %v182_v9, %v128_v14  ;;  %v199_v24 = vadd.f32 %v183_v10, %v129_v15  ;;  %v354_v25 = vand.u32 2147483647, %v1362_v16  ;;  %v355_v27 = vand.u32 2147483647, %v1364_v17 }
  0x9c   :  { %v298_v28 = vpop.permute.xlu2 %297 }
  0x9d   :  { %v268_v29 = vadd.f32 %v252_v18, %v198_v22  ;;  %v269_v32 = vadd.f32 %v253_v19, %v199_v24  ;;  %v370_v34 = vsub.f32 0.0, %v354_v25  ;;  %v371_v35 = vsub.f32 0.0, %v355_v27 }
  0x9e   :  { %v1373_v38 = vadd.f32 %v298_v28, %v264_v33  ;;  %v1381_v43 = vadd.f32 %v298_v28, %v265_v36  ;;  %v247_v33 = vmul.f32 %v1343_v55, %v1339_v53  ;;  %v243_v36 = vmul.f32 %v1343_v55, %v1349_v63 }
  0x9f   :  { %v398_v39 = vmul.f32 1.442695, %v370_v34  ;;  %v1376_v31 = vadd.f32 %v1319_v37, %v268_v29  ;;  %v1379_v42 = vadd.f32 %v1319_v37, %v269_v32  ;;  %v400_v45 = vmul.f32 1.442695, %v371_v35 }
  0xa0   :  { %v90_v23 = vpop.permute.xlu0 %89  ;;  %v85_v40 = vpop.permute.xlu1 %84  ;;  %v352_v46 = vand.u32 2147483647, %v1373_v38  ;;  %v353_v57 = vand.u32 2147483647, %v1381_v43  ;;  %v246_v32 = vmul.f32 %v1341_v54, %v1339_v53 }
  0xa1   :  { %1012 = vpow2.f32 %v398_v39  ;;  %v356_v48 = vand.u32 2147483647, %v1376_v31  ;;  %v357_v56 = vand.u32 2147483647, %v1379_v42  ;;  %v122_v4 = vmul.f32 %v1335_v51, %v90_v23 }
  0xa2   :  { %1014 = vpow2.f32 %v400_v45  ;;  %v368_v60 = vsub.f32 0.0, %v352_v46  ;;  %v369_v3 = vsub.f32 0.0, %v353_v57  ;;  %v123_v5 = vmul.f32 %v1337_v52, %v90_v23 }
  0xa3   :  { %v372_v58 = vsub.f32 0.0, %v356_v48  ;;  %v373_v59 = vsub.f32 0.0, %v357_v56  ;;  %v120_v6 = vmul.f32 %v1335_v51, %v85_v40  ;;  %v121_v8 = vmul.f32 %v1337_v52, %v85_v40 }
  0xa4   :  { %v1384_v47 = vpop.permute.xlu2 %74  ;;  %v394_v13 = vmul.f32 1.442695, %v368_v60  ;;  %v396_v22 = vmul.f32 1.442695, %v369_v3  ;;  %v192_v30 = vadd.f32 %v176_v61, %v122_v4  ;;  %v193_v27 = vadd.f32 %v177_v62, %v123_v5 }
  0xa5   :  { %v402_v1 = vmul.f32 1.442695, %v372_v58  ;;  %v404_v2 = vmul.f32 1.442695, %v373_v59 }
  0xa6   :  { %v262_v57 = vadd.f32 %v246_v32, %v192_v30  ;;  %v263_v58 = vadd.f32 %v247_v33, %v193_v27  ;;  %v340_v33 = vmax.f32 %v1376_v31, 0.0 }
  0xa7   :  { %v1013_v37 = vpop.eup %1012  ;;  %1016 = vpow2.f32 %v402_v1 }
  0xa8   :  { %v80_v0 = vpop.permute.xlu0 %79  ;;  %v418_v12 = vadd.f32 1.0, %v1013_v37  ;;  %v1015_v14 = vpop.eup %1014  ;;  %1018 = vpow2.f32 %v404_v2 }
  0xa9   :  { %v144_v7 = vpop.permute.xlu1 %143  ;;  %v118_v15 = vmul.f32 %v1335_v51, %v80_v0  ;;  %v119_v24 = vmul.f32 %v1337_v52, %v80_v0  ;;  %v419_v34 = vadd.f32 1.0, %v1015_v14  ;;  %1020 = vpow2.f32 %v394_v13 }
  0xaa   :  { %v174_v9 = vmul.f32 %v1331_v49, %v144_v7  ;;  %v175_v10 = vmul.f32 %v1333_v50, %v144_v7  ;;  %1022 = vlog2.f32 %v418_v12 }
  0xab   :  { %v188_v39 = vadd.f32 %v172_v20, %v118_v15  ;;  %v189_v40 = vadd.f32 %v173_v21, %v119_v24  ;;  %1024 = vpow2.f32 %v396_v22 }
  0xac   :  { %v190_v18 = vadd.f32 %v174_v9, %v120_v6  ;;  %v191_v19 = vadd.f32 %v175_v10, %v121_v8  ;;  %1026 = vlog2.f32 %v419_v34 }
  0xad   :  { %v1409_v25 = vpop.permute.xlu2 %201  ;;  %v1017_v35 = vpop.eup %1016  ;;  %v258_v61 = vadd.f32 %v242_v44, %v188_v39  ;;  %v259_v2 = vadd.f32 %v243_v36, %v189_v40 }
  0xae   :  { %v260_v28 = vadd.f32 %v244_v26, %v190_v18  ;;  %v261_v29 = vadd.f32 %v245_v11, %v191_v19  ;;  %v420_v48 = vadd.f32 1.0, %v1017_v35  ;;  %v1019_v56 = vpop.eup %1018 }
  0xaf   :  { %v1021_v62 = vpop.eup %1020  ;;  %v421_v3 = vadd.f32 1.0, %v1019_v56  ;;  %v339_v56 = vmax.f32 %v1364_v17, 0.0 }
  0xb0   :  { %v288_v23 = vpop.permute.xlu0 %287  ;;  %1028 = vlog2.f32 %v420_v48  ;;  %v1023_v4 = vpop.eup %1022  ;;  %v416_v15 = vadd.f32 1.0, %v1021_v62 }
  0xb1   :  { %v1419_v45 = vadd.f32 %v288_v23, %v260_v28  ;;  %v1421_v46 = vadd.f32 %v288_v23, %v261_v29  ;;  %v1025_v11 = vpop.eup %1024  ;;  %1030 = vlog2.f32 %v421_v3  ;;  %v447_v19 = vmul.f32 0.6931472, %v1023_v4 }
  0xb2   :  { %v293_v53 = vpop.permute.xlu1 %292  ;;  %v1027_v14 = vpop.eup %1026  ;;  %v338_v29 = vmax.f32 %v1362_v16, 0.0  ;;  %v417_v34 = vadd.f32 1.0, %v1025_v11 }
  0xb3   :  { %v348_v59 = vand.u32 2147483647, %v1419_v45  ;;  %v349_v60 = vand.u32 2147483647, %v1421_v46  ;;  %v1425_v63 = vadd.f32 %v293_v53, %v262_v57  ;;  %v1427_v37 = vadd.f32 %v293_v53, %v263_v58 }
  0xb4   :  { %v449_v44 = vmul.f32 0.6931472, %v1027_v14  ;;  %v466_v23 = vadd.f32 %v447_v19, %v338_v29  ;;  %v341_v53 = vmax.f32 %v1379_v42, 0.0  ;;  %v117_v14 = vmul.f32 %v1337_v52, %v1384_v47 }
  0xb5   :  { %v364_v0 = vsub.f32 0.0, %v348_v59  ;;  %v365_v1 = vsub.f32 0.0, %v349_v60  ;;  %v350_v5 = vand.u32 2147483647, %v1425_v63  ;;  %v351_v6 = vand.u32 2147483647, %v1427_v37 }
  0xb6   :  { %v283_v7 = vpop.permute.xlu2 %282  ;;  %v1029_v20 = vpop.eup %1028  ;;  %v467_v60 = vadd.f32 %v449_v44, %v339_v56 }
  0xb7   :  { %v386_v8 = vmul.f32 1.442695, %v364_v0  ;;  %v388_v9 = vmul.f32 1.442695, %v365_v1  ;;  %v1431_v10 = vadd.f32 %v283_v7, %v258_v61  ;;  %v1433_v26 = vadd.f32 %v283_v7, %v259_v2  ;;  %v1031_v36 = vpop.eup %1030 }
  0xb8   :  { %v366_v12 = vsub.f32 0.0, %v350_v5  ;;  %v367_v13 = vsub.f32 0.0, %v351_v6  ;;  %v451_v28 = vmul.f32 0.6931472, %v1029_v20  ;;  %v453_v16 = vmul.f32 0.6931472, %v1031_v36 }
  0xb9   :  { %1032 = vpow2.f32 %v386_v8  ;;  %v346_v18 = vand.u32 2147483647, %v1431_v10  ;;  %v347_v24 = vand.u32 2147483647, %v1433_v26  ;;  %v168_v5 = vmul.f32 %v1331_v49, %v1327_v41 }
  0xba   :  { %1034 = vpow2.f32 %v388_v9  ;;  %v390_v21 = vmul.f32 1.442695, %v366_v12  ;;  %v392_v22 = vmul.f32 1.442695, %v367_v13  ;;  %v1437_v30 = vpop.permute.xlu1 %69  ;;  %v468_v40 = vadd.f32 %v451_v28, %v340_v33 }
  0xbb   :  { %v362_v27 = vsub.f32 0.0, %v346_v18  ;;  %v363_v32 = vsub.f32 0.0, %v347_v24  ;;  %v469_v61 = vadd.f32 %v453_v16, %v341_v53  ;;  %v169_v7 = vmul.f32 %v1333_v50, %v1327_v41 }
  0xbc   :  { %1036 = vpow2.f32 %v390_v21  ;;  %v476_v31 = vpack.c.bf16 %v468_v40, %v466_v23  ;;  %v336_v8 = vmax.f32 %v1373_v38, 0.0  ;;  %v337_v12 = vmax.f32 %v1381_v43, 0.0 }
  0xbd   :  { %1038 = vpow2.f32 %v392_v22  ;;  %v382_v35 = vmul.f32 1.442695, %v362_v27  ;;  %v384_v39 = vmul.f32 1.442695, %v363_v32  ;;  %v477_v2 = vpack.c.bf16 %v469_v61, %v467_v60 }
  0xbe   :  { %1040 = vlog2.f32 %v416_v15  ;;  %555 = vmatpush.bf16.msra.mxu0 %v476_v31  ;;  %977 = vmatpush.bf16.msra.mxu2 %v476_v31  ;;  %v116_v13 = vmul.f32 %v1335_v51, %v1384_v47  ;;  %v238_v18 = vmul.f32 %v1341_v54, %v1409_v25  ;;  %v114_v41 = vmul.f32 %v1335_v51, %v1437_v30 }
  0xbf   :  { %v1033_v48 = vpop.eup %1032  ;;  %1042 = vpow2.f32 %v382_v35  ;;  %584 = vmatpush.bf16.msra.mxu1 %v477_v2  ;;  %981 = vmatpush.bf16.msra.mxu3 %v477_v2  ;;  %v239_v43 = vmul.f32 %v1343_v55, %v1409_v25  ;;  %v332_v20 = vmax.f32 %v1419_v45, 0.0  ;;  %v333_v22 = vmax.f32 %v1421_v46, 0.0 }
  0xc0   :  { %v1035_v57 = vpop.eup %1034  ;;  %v412_v58 = vadd.f32 1.0, %v1033_v48  ;;  %1044 = vpow2.f32 %v384_v39  ;;  %v334_v24 = vmax.f32 %v1425_v63, 0.0  ;;  %v330_v29 = vmax.f32 %v1431_v10, 0.0 }
  0xc1   :  { %v413_v59 = vadd.f32 1.0, %v1035_v57  ;;  %1046 = vlog2.f32 %v417_v34  ;;  %v331_v32 = vmax.f32 %v1433_v26, 0.0  ;;  %v115_v25 = vmul.f32 %v1337_v52, %v1437_v30  ;;  %v278_v57 = vpop.permute.xlu2 %277 }
  0xc2   :  { %v1037_v62 = vpop.eup %1036  ;;  %1048 = vlog2.f32 %v412_v58 }
  0xc3   :  { %v1039_v0 = vpop.eup %1038  ;;  %v414_v1 = vadd.f32 1.0, %v1037_v62  ;;  %v136_v3 = vpop.permute.xlu1 %135  ;;  %1050 = vlog2.f32 %v413_v59  ;;  %v185_v16 = vadd.f32 %v169_v7, %v115_v25 }
  0xc4   :  { %v1041_v17 = vpop.eup %1040  ;;  %v415_v4 = vadd.f32 1.0, %v1039_v0  ;;  %v170_v38 = vmul.f32 %v1331_v49, %v136_v3  ;;  %v171_v21 = vmul.f32 %v1333_v50, %v136_v3  ;;  %v335_v49 = vmax.f32 %v1427_v37, 0.0 }
  0xc5   :  { %v1043_v42 = vpop.eup %1042  ;;  %1052 = vlog2.f32 %v414_v1  ;;  %v443_v27 = vmul.f32 0.6931472, %v1041_v17  ;;  %v184_v50 = vadd.f32 %v168_v5, %v114_v41 }
  0xc6   :  { %v1045_v6 = vpop.eup %1044  ;;  %v410_v9 = vadd.f32 1.0, %v1043_v42  ;;  %1054 = vlog2.f32 %v415_v4  ;;  %v186_v33 = vadd.f32 %v170_v38, %v116_v13  ;;  %v187_v44 = vadd.f32 %v171_v21, %v117_v14 }
  0xc7   :  { %v1047_v11 = vpop.eup %1046  ;;  %v411_v15 = vadd.f32 1.0, %v1045_v6  ;;  %v464_v10 = vadd.f32 %v443_v27, %v336_v8  ;;  %v254_v17 = vadd.f32 %v238_v18, %v184_v50  ;;  %v255_v4 = vadd.f32 %v239_v43, %v185_v16 }
  0xc8   :  { %1056 = vlog2.f32 %v410_v9  ;;  %v1049_v19 = vpop.eup %1048  ;;  %v445_v28 = vmul.f32 0.6931472, %v1047_v11 }
  0xc9   :  { %1058 = vlog2.f32 %v411_v15  ;;  %v1051_v47 = vpop.eup %1050  ;;  %v435_v46 = vmul.f32 0.6931472, %v1049_v19 }
  0xca   :  { %v465_v40 = vadd.f32 %v445_v28, %v337_v12  ;;  %v437_v26 = vmul.f32 0.6931472, %v1051_v47 }
  0xcb   :  { %v1053_v51 = vpop.eup %1052  ;;  %v460_v31 = vadd.f32 %v435_v46, %v332_v20 }
  0xcc   :  { %v1055_v45 = vpop.eup %1054  ;;  %v206_v34 = vpop.permute.xlu1 %205  ;;  %v439_v35 = vmul.f32 0.6931472, %v1053_v51  ;;  %v461_v0 = vadd.f32 %v437_v26, %v333_v22  ;;  %v973_v26 = vld [vmem:[%s1583_s3 + $0x8] sm:$0xff] }
  0xcd   :  { %v240_v63 = vmul.f32 %v1341_v54, %v206_v34  ;;  %v241_v36 = vmul.f32 %v1343_v55, %v206_v34  ;;  %v441_v39 = vmul.f32 0.6931472, %v1055_v45 }
  0xce   :  { %v1057_v37 = vpop.eup %1056  ;;  %v462_v23 = vadd.f32 %v439_v35, %v334_v24 }
  0xcf   :  { %v1059_v48 = vpop.eup %1058  ;;  %v256_v56 = vadd.f32 %v240_v63, %v186_v33  ;;  %v257_v52 = vadd.f32 %v241_v36, %v187_v44  ;;  %v463_v30 = vadd.f32 %v441_v39, %v335_v49  ;;  %v431_v53 = vmul.f32 0.6931472, %v1057_v37 }
  0xd0   :  { %v474_v58 = vpack.c.bf16 %v464_v10, %v462_v23  ;;  %v433_v59 = vmul.f32 0.6931472, %v1059_v48  ;;  %v972_v10 = vld [vmem:[%s1583_s3] sm:$0xff]  ;;  %v974_v48 = vld [vmem:[%s1583_s3 + $0x10] sm:$0xff] }
  0xd1   :  { %v1471_v60 = vadd.f32 %v278_v57, %v256_v56  ;;  %v1473_v54 = vadd.f32 %v278_v57, %v257_v52  ;;  %v475_v55 = vpack.c.bf16 %v465_v40, %v463_v30  ;;  %v458_v61 = vadd.f32 %v431_v53, %v330_v29  ;;  %v975_v40 = vld [vmem:[%s1583_s3 + $0x18] sm:$0xff]  ;;  %v516_v30 = vpop.permute.xlu2 %515 }
  0xd2   :  { %556 = vmatpush.bf16.msra.mxu0 %v474_v58  ;;  %978 = vmatpush.bf16.msra.mxu2 %v474_v58  ;;  %v459_v62 = vadd.f32 %v433_v59, %v331_v32 }
  0xd3   :  { %v344_v1 = vand.u32 2147483647, %v1471_v60  ;;  %v345_v2 = vand.u32 2147483647, %v1473_v54  ;;  %585 = vmatpush.bf16.msra.mxu1 %v475_v55  ;;  %982 = vmatpush.bf16.msra.mxu3 %v475_v55  ;;  %v472_v3 = vpack.c.bf16 %v460_v31, %v458_v61  ;;  %v328_v50 = vmax.f32 %v1471_v60, 0.0 }
  0xd4   :  { %v473_v42 = vpack.c.bf16 %v461_v0, %v459_v62  ;;  %v329_v35 = vmax.f32 %v1473_v54, 0.0 }
  0xd5   :  { %v360_v5 = vsub.f32 0.0, %v344_v1  ;;  %v361_v6 = vsub.f32 0.0, %v345_v2  ;;  %v273_v7 = vpop.permute.xlu1 %272 }
  0xd6   :  { %v310_v8 = vadd.f32 %v273_v7, %v254_v17  ;;  %v311_v9 = vadd.f32 %v273_v7, %v255_v4  ;;  %557 = vmatpush.bf16.msra.mxu0 %v472_v3  ;;  %979 = vmatpush.bf16.msra.mxu2 %v472_v3  ;;  %v501_v3 = vpop.permute.xlu0 %500 }
  0xd7   :  { %v378_v11 = vmul.f32 1.442695, %v360_v5  ;;  %v380_v12 = vmul.f32 1.442695, %v361_v6  ;;  %586 = vmatpush.bf16.msra.mxu1 %v473_v42  ;;  %983 = vmatpush.bf16.msra.mxu3 %v473_v42 }
  0xd8   :  { %v342_v13 = vand.u32 2147483647, %v310_v8  ;;  %v343_v14 = vand.u32 2147483647, %v311_v9  ;;  %v326_v45 = vmax.f32 %v310_v8, 0.0  ;;  %v327_v34 = vmax.f32 %v311_v9, 0.0 }
  0xd9   :  { %1060 = vpow2.f32 %v378_v11  ;;  %v491_v62 = vpop.permute.xlu2 %490 }
  0xda   :  { %1062 = vpow2.f32 %v380_v12  ;;  %v358_v15 = vsub.f32 0.0, %v342_v13  ;;  %v359_v41 = vsub.f32 0.0, %v343_v14 }
  0xdc   :  { %v374_v18 = vmul.f32 1.442695, %v358_v15  ;;  %v376_v38 = vmul.f32 1.442695, %v359_v41 }
  0xdd   :  { %v511_v53 = vpop.permute.xlu1 %510 }
  0xde   :  { %1064 = vpow2.f32 %v374_v18 }
  0xdf   :  { %v1061_v19 = vpop.eup %1060  ;;  %1066 = vpow2.f32 %v376_v38 }
  0xe0   :  { %v1063_v43 = vpop.eup %1062  ;;  %v408_v20 = vadd.f32 1.0, %v1061_v19 }
  0xe1   :  { %v409_v21 = vadd.f32 1.0, %v1063_v43  ;;  %v486_v41 = vpop.permute.xlu2 %485 }
  0xe2   :  { %1068 = vlog2.f32 %v408_v20 }
  0xe3   :  { %1070 = vlog2.f32 %v409_v21  ;;  %v496_v21 = vpop.permute.xlu0 %495 }
  0xe4   :  { %v1065_v47 = vpop.eup %1064 }
  0xe5   :  { %v1067_v22 = vpop.eup %1066  ;;  %v406_v24 = vadd.f32 1.0, %v1065_v47  ;;  %v1507_v42 = vpop.permute.xlu1 %505 }
  0xe6   :  { %v407_v27 = vadd.f32 1.0, %v1067_v22 }
  0xe7   :  { %1072 = vlog2.f32 %v406_v24 }
  0xe8   :  { %1074 = vlog2.f32 %v407_v27  ;;  %v1069_v28 = vpop.eup %1068 }
  0xe9   :  { %v1071_v51 = vpop.eup %1070  ;;  %v427_v49 = vmul.f32 0.6931472, %v1069_v28 }
  0xea   :  { %v429_v32 = vmul.f32 0.6931472, %v1071_v51 }
  0xeb   :  { %v456_v63 = vadd.f32 %v427_v49, %v328_v50 }
  0xec   :  { %v457_v39 = vadd.f32 %v429_v32, %v329_v35 }
  0xed   :  { %v1073_v29 = vpop.eup %1072  ;;  %v481_v24 = vpop.permute.xlu1 %480 }
  0xee   :  { %v1075_v25 = vpop.eup %1074  ;;  %v423_v33 = vmul.f32 0.6931472, %v1073_v29 }
  0xef   :  { %v425_v46 = vmul.f32 0.6931472, %v1075_v25 }
  0xf0   :  { %v454_v44 = vadd.f32 %v423_v33, %v326_v45 }
  0xf1   :  { %v455_v36 = vadd.f32 %v425_v46, %v327_v34 }
  0xf2   :  { %v470_v37 = vpack.c.bf16 %v456_v63, %v454_v44 }
  0xf3   :  { %v471_v23 = vpack.c.bf16 %v457_v39, %v455_v36 }
  0xf4   :  { %558 = vmatpush.bf16.msra.mxu0 %v470_v37  ;;  %980 = vmatpush.bf16.msra.mxu2 %v470_v37 }
  0xf5   :  { %587 = vmatpush.bf16.msra.mxu1 %v471_v23  ;;  %984 = vmatpush.bf16.msra.mxu3 %v471_v23 }
  0xf7   :  { %956 = vmatmul.msk.bf16.vlgmr.msra.gmra.mxu0 %vm538_vm0, %v972_v10  ;;  %959 = vmatmul.msk.bf16.vlgmr.msra.gmra.mxu2 %vm538_vm0, %v975_v40 }
  0xf8   :  { %960 = vmatmul.msk.bf16.vlgmr.msra.gmra.mxu1 %vm538_vm0, %v972_v10  ;;  %963 = vmatmul.msk.bf16.vlgmr.msra.gmra.mxu3 %vm538_vm0, %v975_v40 }
 0x107   :  { %957 = vmatmul.msk.bf16.gmra.mxu0 %vm538_vm0, %v973_v26 }
 0x108   :  { %961 = vmatmul.msk.bf16.gmra.mxu1 %vm538_vm0, %v973_v26 }
 0x117   :  { %958 = vmatmul.msk.bf16.gmra.mxu0 %vm538_vm0, %v974_v48 }
 0x118   :  { %962 = vmatmul.msk.bf16.gmra.mxu1 %vm538_vm0, %v974_v48 }
 0x174   :  { %v560_v56 = vpop.f32.mrf.mxu0 }
 0x175   :  { %v589_v52 = vpop.f32.mrf.mxu1  ;;  %v1519_v28 = vadd.f32 %v560_v56, %v481_v24 }
 0x176   :  { %v1524_v29 = vadd.f32 %v589_v52, %v481_v24 }
 0x177   :  { %v625_v46 = vand.u32 2147483647, %v1519_v28 }
 0x178   :  { %v626_v36 = vand.u32 2147483647, %v1524_v29 }
 0x17a   :  { %v575_v16 = vpop.f32.mrf.mxu2 }
 0x17b   :  { %v1499_v57 = vadd.f32 %v575_v16, %v511_v53  ;;  %v604_v58 = vpop.f32.mrf.mxu3  ;;  %v641_v16 = vsub.f32 0.0, %v625_v46 }
 0x17c   :  { %v1501_v31 = vadd.f32 %v604_v58, %v511_v53  ;;  %v562_v59 = vpop.f32.mrf.mxu0 }
 0x17d   :  { %v637_v60 = vand.u32 2147483647, %v1499_v57  ;;  %v591_v54 = vpop.f32.mrf.mxu1  ;;  %v1513_v18 = vadd.f32 %v562_v59, %v486_v41 }
 0x17e   :  { %v638_v55 = vand.u32 2147483647, %v1501_v31  ;;  %v1527_v50 = vadd.f32 %v591_v54, %v486_v41  ;;  %v642_v54 = vsub.f32 0.0, %v626_v36 }
 0x17f   :  { %v653_v61 = vsub.f32 0.0, %v637_v60  ;;  %v627_v51 = vand.u32 2147483647, %v1513_v18 }
 0x180   :  { %v654_v0 = vsub.f32 0.0, %v638_v55  ;;  %v628_v10 = vand.u32 2147483647, %v1527_v50  ;;  %v659_v46 = vmul.f32 1.442695, %v642_v54 }
 0x181   :  { %v681_v1 = vmul.f32 1.442695, %v653_v61  ;;  %v643_v44 = vsub.f32 0.0, %v627_v51 }
 0x182   :  { %v577_v2 = vpop.f32.mrf.mxu2  ;;  %v683_v5 = vmul.f32 1.442695, %v654_v0  ;;  %v644_v0 = vsub.f32 0.0, %v628_v10 }
 0x183   :  { %1076 = vpow2.f32 %v681_v1  ;;  %v1505_v17 = vadd.f32 %v577_v2, %v516_v30  ;;  %v606_v4 = vpop.f32.mrf.mxu3  ;;  %v661_v58 = vmul.f32 1.442695, %v643_v44 }
 0x184   :  { %v1509_v6 = vadd.f32 %v606_v4, %v516_v30  ;;  %v565_v7 = vpop.f32.mrf.mxu0  ;;  %1078 = vpow2.f32 %v683_v5  ;;  %v663_v51 = vmul.f32 1.442695, %v644_v0 }
 0x185   :  { %v639_v8 = vand.u32 2147483647, %v1505_v17  ;;  %v594_v9 = vpop.f32.mrf.mxu1  ;;  %v1515_v43 = vadd.f32 %v565_v7, %v491_v62  ;;  %v623_v5 = vmax.f32 %v1505_v17, 0.0 }
 0x186   :  { %v640_v11 = vand.u32 2147483647, %v1509_v6  ;;  %v1529_v34 = vadd.f32 %v594_v9, %v491_v62  ;;  %v621_v62 = vmax.f32 %v1499_v57, 0.0 }
 0x187   :  { %v655_v12 = vsub.f32 0.0, %v639_v8  ;;  %v629_v32 = vand.u32 2147483647, %v1515_v43 }
 0x188   :  { %v656_v13 = vsub.f32 0.0, %v640_v11  ;;  %v630_v52 = vand.u32 2147483647, %v1529_v34 }
 0x189   :  { %v1077_v14 = vpop.eup %1076  ;;  %v685_v15 = vmul.f32 1.442695, %v655_v12  ;;  %v645_v39 = vsub.f32 0.0, %v629_v32 }
 0x18a   :  { %v687_v38 = vmul.f32 1.442695, %v656_v13  ;;  %v701_v19 = vadd.f32 1.0, %v1077_v14  ;;  %v1079_v22 = vpop.eup %1078  ;;  %v657_v14 = vmul.f32 1.442695, %v641_v16 }
 0x18b   :  { %1080 = vpow2.f32 %v685_v15  ;;  %v702_v45 = vadd.f32 1.0, %v1079_v22  ;;  %v665_v55 = vmul.f32 1.442695, %v645_v39  ;;  %v622_v15 = vmax.f32 %v1501_v31, 0.0 }
 0x18c   :  { %v567_v20 = vpop.f32.mrf.mxu0  ;;  %1082 = vpow2.f32 %v687_v38 }
 0x18d   :  { %v596_v47 = vpop.f32.mrf.mxu1  ;;  %v1517_v27 = vadd.f32 %v567_v20, %v496_v21  ;;  %1084 = vlog2.f32 %v701_v19 }
 0x18e   :  { %v1522_v49 = vadd.f32 %v596_v47, %v496_v21 }
 0x18f   :  { %v631_v35 = vand.u32 2147483647, %v1517_v27 }
 0x190   :  { %v632_v63 = vand.u32 2147483647, %v1522_v49 }
 0x191   :  { %v1081_v25 = vpop.eup %1080  ;;  %v647_v30 = vsub.f32 0.0, %v631_v35 }
 0x192   :  { %v703_v33 = vadd.f32 1.0, %v1081_v25  ;;  %v1083_v23 = vpop.eup %1082  ;;  %v648_v59 = vsub.f32 0.0, %v632_v63  ;;  %v624_v25 = vmax.f32 %v1509_v6, 0.0 }
 0x193   :  { %v1085_v48 = vpop.eup %1084  ;;  %v704_v56 = vadd.f32 1.0, %v1083_v23  ;;  %v669_v7 = vmul.f32 1.442695, %v647_v30 }
 0x194   :  { %1086 = vlog2.f32 %v703_v33  ;;  %v570_v37 = vpop.f32.mrf.mxu0  ;;  %v730_v2 = vmul.f32 0.6931472, %v1085_v48  ;;  %v671_v11 = vmul.f32 1.442695, %v648_v59 }
 0x195   :  { %1088 = vlog2.f32 %v702_v45  ;;  %v1536_v40 = vadd.f32 %v570_v37, %v501_v3  ;;  %v599_v26 = vpop.f32.mrf.mxu1 }
 0x196   :  { %v1539_v53 = vadd.f32 %v599_v26, %v501_v3  ;;  %1090 = vlog2.f32 %v704_v56  ;;  %v646_v3 = vsub.f32 0.0, %v630_v52  ;;  %v749_v17 = vadd.f32 %v730_v2, %v621_v62 }
 0x197   :  { %v633_v60 = vand.u32 2147483647, %v1536_v40  ;;  %1092 = vpow2.f32 %v661_v58 }
 0x198   :  { %v634_v61 = vand.u32 2147483647, %v1539_v53  ;;  %1094 = vpow2.f32 %v665_v55  ;;  %v667_v47 = vmul.f32 1.442695, %v646_v3 }
 0x199   :  { %v649_v1 = vsub.f32 0.0, %v633_v60 }
 0x19a   :  { %v1087_v4 = vpop.eup %1086  ;;  %v650_v8 = vsub.f32 0.0, %v634_v61 }
 0x19b   :  { %v1089_v9 = vpop.eup %1088  ;;  %v673_v12 = vmul.f32 1.442695, %v649_v1  ;;  %v734_v13 = vmul.f32 0.6931472, %v1087_v4 }
 0x19c   :  { %v675_v41 = vmul.f32 1.442695, %v650_v8  ;;  %v572_v57 = vpop.f32.mrf.mxu0  ;;  %v1091_v21 = vpop.eup %1090  ;;  %v732_v24 = vmul.f32 0.6931472, %v1089_v9 }
 0x19d   :  { %1096 = vpow2.f32 %v673_v12  ;;  %v1547_v38 = vadd.f32 %v572_v57, %v1507_v42  ;;  %v601_v19 = vpop.f32.mrf.mxu1  ;;  %v751_v20 = vadd.f32 %v734_v13, %v623_v5  ;;  %v736_v33 = vmul.f32 0.6931472, %v1091_v21  ;;  %v1093_v35 = vpop.eup %1092 }
 0x19e   :  { %1098 = vpow2.f32 %v669_v7  ;;  %v1550_v22 = vadd.f32 %v601_v19, %v1507_v42  ;;  %v1095_v63 = vpop.eup %1094  ;;  %v750_v36 = vadd.f32 %v732_v24, %v622_v15  ;;  %v691_v26 = vadd.f32 1.0, %v1093_v35 }
 0x19f   :  { %1100 = vpow2.f32 %v671_v11  ;;  %v635_v31 = vand.u32 2147483647, %v1547_v38  ;;  %v759_v32 = vpack.c.bf16 %v751_v20, %v749_v17  ;;  %v752_v39 = vadd.f32 %v736_v33, %v624_v25 }
 0x1a0   :  { %1102 = vpow2.f32 %v675_v41  ;;  %v636_v45 = vand.u32 2147483647, %v1550_v22  ;;  %v693_v52 = vadd.f32 1.0, %v1095_v63  ;;  %v617_v19 = vmax.f32 %v1536_v40, 0.0 }
 0x1a1   :  { %v651_v44 = vsub.f32 0.0, %v635_v31  ;;  %794 = vmatpush.bf16.msrb.mxu2 %v759_v32  ;;  %1104 = vpow2.f32 %v667_v47  ;;  %v760_v48 = vpack.c.bf16 %v752_v39, %v750_v36  ;;  %v619_v17 = vmax.f32 %v1547_v38, 0.0 }
 0x1a2   :  { %v652_v42 = vsub.f32 0.0, %v636_v45  ;;  %1106 = vpow2.f32 %v657_v14  ;;  %v615_v31 = vmax.f32 %v1517_v27, 0.0  ;;  %v618_v32 = vmax.f32 %v1539_v53, 0.0 }
 0x1a3   :  { %v1097_v37 = vpop.eup %1096  ;;  %v677_v23 = vmul.f32 1.442695, %v651_v44  ;;  %1108 = vpow2.f32 %v663_v51  ;;  %812 = vmatpush.bf16.msrb.mxu3 %v760_v48  ;;  %v620_v25 = vmax.f32 %v1550_v22, 0.0  ;;  %v613_v38 = vmax.f32 %v1515_v43, 0.0 }
 0x1a4   :  { %v1099_v10 = vpop.eup %1098  ;;  %v679_v6 = vmul.f32 1.442695, %v652_v42  ;;  %v697_v16 = vadd.f32 1.0, %v1097_v37  ;;  %v616_v42 = vmax.f32 %v1522_v49, 0.0  ;;  %v611_v22 = vmax.f32 %v1513_v18, 0.0 }
 0x1a5   :  { %v1101_v56 = vpop.eup %1100  ;;  %1110 = vpow2.f32 %v677_v23  ;;  %v695_v58 = vadd.f32 1.0, %v1099_v10  ;;  %v609_v43 = vmax.f32 %v1519_v28, 0.0  ;;  %v612_v49 = vmax.f32 %v1527_v50, 0.0  ;;  %v976_v28 = vld [vmem:[%s1585_s5] sm:$0xff] }
 0x1a6   :  { %v1103_v30 = vpop.eup %1102  ;;  %1112 = vpow2.f32 %v659_v46  ;;  %v696_v55 = vadd.f32 1.0, %v1101_v56 }
 0x1a7   :  { %1114 = vpow2.f32 %v679_v6  ;;  %v1105_v59 = vpop.eup %1104  ;;  %v698_v60 = vadd.f32 1.0, %v1103_v30 }
 0x1a8   :  { %1116 = vlog2.f32 %v691_v26  ;;  %v1107_v54 = vpop.eup %1106  ;;  %v694_v0 = vadd.f32 1.0, %v1105_v59  ;;  %v614_v26 = vmax.f32 %v1529_v34, 0.0 }
 0x1a9   :  { %1118 = vlog2.f32 %v693_v52  ;;  %v1109_v61 = vpop.eup %1108  ;;  %v689_v5 = vadd.f32 1.0, %v1107_v54  ;;  %v610_v54 = vmax.f32 %v1524_v29, 0.0  ;;  %v63_v29 = vld [vmem:[%s1585_s5 + $0x8] sm:$0xf]  ;;  %s1185_s5 = smov [#allocation2]  }
 0x1aa   :  { %1120 = vlog2.f32 %v697_v16  ;;  %v692_v7 = vadd.f32 1.0, %v1109_v61  ;;  %s926_s16 = sshll.u32 %s1185_s5, 4  ;;  %s927_s16 = int_to_ptr.vmem [resolvable:$true] %s926_s16 }
 0x1ab   :  { %v1111_v62 = vpop.eup %1110  ;;  %1122 = vlog2.f32 %v695_v58 }
 0x1ac   :  { %v1113_v1 = vpop.eup %1112  ;;  %1124 = vlog2.f32 %v698_v60  ;;  %v699_v2 = vadd.f32 1.0, %v1111_v62 }
 0x1ad   :  { %v1115_v4 = vpop.eup %1114  ;;  %1126 = vlog2.f32 %v696_v55  ;;  %v690_v12 = vadd.f32 1.0, %v1113_v1 }
 0x1ae   :  { %v1117_v3 = vpop.eup %1116  ;;  %1128 = vlog2.f32 %v699_v2  ;;  %v700_v8 = vadd.f32 1.0, %v1115_v4 }
 0x1af   :  { %v1119_v9 = vpop.eup %1118  ;;  %1130 = vlog2.f32 %v694_v0  ;;  %v710_v39 = vmul.f32 0.6931472, %v1117_v3  ;;  %v781_v0 = vunpack.c.l.b16 %v63_v29 }
 0x1b0   :  { %v1121_v11 = vpop.eup %1120  ;;  %1132 = vlog2.f32 %v700_v8  ;;  %v714_v45 = vmul.f32 0.6931472, %v1119_v9  ;;  %v769_v8 = vpop.permute.xlu2 %768 }
 0x1b1   :  { %v1123_v13 = vpop.eup %1122  ;;  %1134 = vlog2.f32 %v689_v5  ;;  %v722_v41 = vmul.f32 0.6931472, %v1121_v11  ;;  %v739_v59 = vadd.f32 %v710_v39, %v611_v22  ;;  %v783_v1 = vpack.c.b16 %v781_v0, %v781_v0  ;;  %v774_v11 = vpop.permute.xlu1 %773 }
 0x1b2   :  { %v1125_v14 = vpop.eup %1124  ;;  %1136 = vlog2.f32 %v692_v7  ;;  %v718_v24 = vmul.f32 0.6931472, %v1123_v13  ;;  %v741_v56 = vadd.f32 %v714_v45, %v613_v38  ;;  %v764_v7 = vpop.permute.xlu0 %763 }
 0x1b3   :  { %v1127_v15 = vpop.eup %1126  ;;  %1138 = vlog2.f32 %v690_v12  ;;  %v724_v47 = vmul.f32 0.6931472, %v1125_v14  ;;  %v745_v35 = vadd.f32 %v722_v41, %v617_v19 }
 0x1b4   :  { %v1129_v57 = vpop.eup %1128  ;;  %v720_v63 = vmul.f32 0.6931472, %v1127_v15  ;;  %v743_v10 = vadd.f32 %v718_v24, %v615_v31 }
 0x1b5   :  { %v1131_v20 = vpop.eup %1130  ;;  %v726_v21 = vmul.f32 0.6931472, %v1129_v57  ;;  %v746_v23 = vadd.f32 %v724_v47, %v618_v32 }
 0x1b6   :  { %v1133_v51 = vpop.eup %1132  ;;  %v716_v36 = vmul.f32 0.6931472, %v1131_v20  ;;  %v744_v52 = vadd.f32 %v720_v63, %v616_v42  ;;  %v755_v16 = vpack.c.bf16 %v743_v10, %v741_v56 }
 0x1b7   :  { %v1135_v33 = vpop.eup %1134  ;;  %v747_v46 = vadd.f32 %v726_v21, %v619_v17  ;;  %v728_v44 = vmul.f32 0.6931472, %v1133_v51 }
 0x1b8   :  { %v1137_v40 = vpop.eup %1136  ;;  %v706_v6 = vmul.f32 0.6931472, %v1135_v33  ;;  %v742_v58 = vadd.f32 %v716_v36, %v614_v26 }
 0x1b9   :  { %v757_v37 = vpack.c.bf16 %v747_v46, %v745_v35  ;;  %v748_v27 = vadd.f32 %v728_v44, %v620_v25  ;;  %v1139_v53 = vpop.eup %1138  ;;  %v712_v30 = vmul.f32 0.6931472, %v1137_v40 }
 0x1ba   :  { %v708_v60 = vmul.f32 0.6931472, %v1139_v53  ;;  %v756_v18 = vpack.c.bf16 %v744_v52, %v742_v58  ;;  %v737_v34 = vadd.f32 %v706_v6, %v609_v43 }
 0x1bb   :  { %795 = vmatpush.bf16.msrb.mxu2 %v757_v37  ;;  %v758_v48 = vpack.c.bf16 %v748_v27, %v746_v23  ;;  %v740_v55 = vadd.f32 %v712_v30, %v612_v49 }
 0x1bc   :  { %v753_v61 = vpack.c.bf16 %v739_v59, %v737_v34  ;;  %v738_v62 = vadd.f32 %v708_v60, %v610_v54 }
 0x1bd   :  { %813 = vmatpush.bf16.msrb.mxu3 %v758_v48 }
 0x1be   :  { %v754_v50 = vpack.c.bf16 %v740_v55, %v738_v62 }
 0x1bf   :  { %796 = vmatpush.bf16.msrb.mxu2 %v755_v16 }
 0x1c1   :  { %814 = vmatpush.bf16.msrb.mxu3 %v756_v18 }
 0x1c3   :  { %797 = vmatpush.bf16.msrb.mxu2 %v753_v61 }
 0x1c5   :  { %815 = vmatpush.bf16.msrb.mxu3 %v754_v50 }
 0x1c6   :  { %968 = vmatmul.msk.bf16.vlgmr.msrb.gmra.mxu2 %vm538_vm0, %v976_v28 }
 0x1c8   :  { %970 = vmatmul.msk.bf16.vlgmr.msrb.gmra.mxu3 %vm538_vm0, %v976_v28 }
 0x1d6   :  { %969 = vmatmul.msk.bf16.gmra.mxu2 %vm538_vm0, %v783_v1 }
 0x1d8   :  { %971 = vmatmul.msk.bf16.gmra.mxu3 %vm538_vm0, %v783_v1 }
 0x249   :  { %v799_v2 = vpop.f32.mrf.mxu2 }
 0x24a   :  { %v800_v9 = vadd.f32 %v799_v2, %v764_v7 }
 0x24b   :  { %v817_v4 = vpop.f32.mrf.mxu3 }
 0x24c   :  { %v818_v13 = vadd.f32 %v817_v4, %v764_v7  ;;  %v826_v57 = vmul.f32 20.0, %v800_v9 }
 0x24e   :  { %v827_v21 = vmul.f32 20.0, %v818_v13 }
 0x251   :  { %v801_v5 = vpop.f32.mrf.mxu2 }
 0x252   :  { %v802_v14 = vadd.f32 %v801_v5, %v769_v8 }
 0x253   :  { %v819_v3 = vpop.f32.mrf.mxu3 }
 0x254   :  { %v820_v19 = vadd.f32 %v819_v3, %v769_v8  ;;  %v828_v47 = vmul.f32 20.0, %v802_v14 }
 0x256   :  { %v829_v31 = vmul.f32 20.0, %v820_v19 }
 0x259   :  { %v804_v12 = vpop.f32.mrf.mxu2 }
 0x25a   :  { %v805_v15 = vadd.f32 %v804_v12, %v774_v11 }
 0x25b   :  { %v822_v41 = vpop.f32.mrf.mxu3 }
 0x25c   :  { %v830_v17 = vmul.f32 20.0, %v805_v15  ;;  %v823_v20 = vadd.f32 %v822_v41, %v774_v11 }
 0x25e   :  { %v832_v24 = vmax.f32 %v826_v57, %v830_v17  ;;  %v831_v51 = vmul.f32 20.0, %v823_v20 }
 0x260   :  { %v833_v32 = vmax.f32 %v832_v24, %v828_v47  ;;  %v840_v25 = vmax.f32 %v827_v21, %v831_v51 }
 0x261   :  { %v806_v45 = vpop.f32.mrf.mxu2 }
 0x262   :  { %v834_v33 = vrot.slane %v833_v32, 4  ;;  %v841_v35 = vmax.f32 %v840_v25, %v829_v31 }
 0x263   :  { %v824_v46 = vpop.f32.mrf.mxu3 }
 0x264   :  { %v835_v44 = vmax.f32 %v833_v32, %v834_v33  ;;  %v842_v63 = vrot.slane %v841_v35, 4 }
 0x266   :  { %v836_v40 = vrot.slane %v835_v44, 2  ;;  %v843_v38 = vmax.f32 %v841_v35, %v842_v63 }
 0x268   :  { %v837_v42 = vmax.f32 %v835_v44, %v836_v40  ;;  %v844_v36 = vrot.slane %v843_v38, 2 }
 0x26a   :  { %v838_v39 = vrot.slane %v837_v42, 1  ;;  %v845_v37 = vmax.f32 %v843_v38, %v844_v36 }
 0x26c   :  { %v839_v23 = vmax.f32 %v837_v42, %v838_v39  ;;  %v846_v27 = vrot.slane %v845_v37, 1 }
 0x26e   :  { %v848_v10 = vsub.f32 %v826_v57, %v839_v23  ;;  %v850_v53 = vsub.f32 %v828_v47, %v839_v23  ;;  %v852_v22 = vsub.f32 %v830_v17, %v839_v23  ;;  %v847_v26 = vmax.f32 %v845_v37, %v846_v27 }
 0x270   :  { %v854_v6 = vmul.f32 1.442695, %v848_v10  ;;  %v858_v48 = vmul.f32 1.442695, %v850_v53  ;;  %v862_v56 = vmul.f32 1.442695, %v852_v22  ;;  %v849_v52 = vsub.f32 %v827_v21, %v847_v26 }
 0x271   :  { %v851_v30 = vsub.f32 %v829_v31, %v847_v26  ;;  %v853_v43 = vsub.f32 %v831_v51, %v847_v26 }
 0x272   :  { %1140 = vpow2.f32 %v854_v6  ;;  %v856_v49 = vmul.f32 1.442695, %v849_v52 }
 0x273   :  { %1142 = vpow2.f32 %v858_v48  ;;  %v860_v16 = vmul.f32 1.442695, %v851_v30  ;;  %v864_v58 = vmul.f32 1.442695, %v853_v43 }
 0x274   :  { %1144 = vpow2.f32 %v862_v56 }
 0x275   :  { %1146 = vpow2.f32 %v856_v49 }
 0x276   :  { %1148 = vpow2.f32 %v860_v16 }
 0x277   :  { %1150 = vpow2.f32 %v864_v58 }
 0x278   :  { %v1141_v59 = vpop.eup %1140 }
 0x279   :  { %v1143_v60 = vpop.eup %1142 }
 0x27a   :  { %v1145_v54 = vpop.eup %1144  ;;  %v866_v18 = vadd.f32 %v1143_v60, %v1141_v59 }
 0x27b   :  { %v1147_v34 = vpop.eup %1146 }
 0x27c   :  { %v1149_v55 = vpop.eup %1148  ;;  %v867_v61 = vadd.f32 %v1145_v54, %v866_v18 }
 0x27d   :  { %v874_v62 = vadd.f32 %v1149_v55, %v1147_v34  ;;  %v1151_v28 = vpop.eup %1150 }
 0x27e   :  { %v868_v50 = vrot.slane %v867_v61, 4 }
 0x27f   :  { %v875_v29 = vadd.f32 %v1151_v28, %v874_v62 }
 0x280   :  { %v869_v0 = vadd.f32 %v868_v50, %v867_v61 }
 0x281   :  { %v876_v1 = vrot.slane %v875_v29, 4 }
 0x282   :  { %v870_v2 = vrot.slane %v869_v0, 2 }
 0x283   :  { %v877_v4 = vadd.f32 %v876_v1, %v875_v29 }
 0x284   :  { %v871_v5 = vadd.f32 %v870_v2, %v869_v0 }
 0x285   :  { %v878_v3 = vrot.slane %v877_v4, 2 }
 0x286   :  { %v872_v7 = vrot.slane %v871_v5, 1 }
 0x287   :  { %v879_v8 = vadd.f32 %v878_v3, %v877_v4 }
 0x288   :  { %v873_v9 = vadd.f32 %v872_v7, %v871_v5 }
 0x289   :  { %v880_v11 = vrot.slane %v879_v8, 1 }
 0x28a   :  { %1152 = vrcp.f32 %v873_v9  ;;  %v893_v57 = vand.u32 2147483648, %v873_v9  ;;  %v891_v20 = vand.u32 2147483647, %v873_v9  ;;  %vm887_vm2 = vweird.f32 %v873_v9 }
 0x28b   :  { %v881_v12 = vadd.f32 %v880_v11, %v879_v8 }
 0x28c   :  { %v894_v51 = vor.u32 1.1754944e-38, %v893_v57  ;;  %vm892_vm5 = vcmp.eq.f32.partialorder %v891_v20, 8.507059e+37 }
 0x28d   :  { %1154 = vrcp.f32 %v881_v12  ;;  %v908_v24 = vand.u32 2147483648, %v881_v12  ;;  %v906_v32 = vand.u32 2147483647, %v881_v12  ;;  %vm902_vm6 = vweird.f32 %v881_v12 }
 0x28f   :  { %v909_v63 = vor.u32 1.1754944e-38, %v908_v24  ;;  %vm907_vm8 = vcmp.eq.f32.partialorder %v906_v32, 8.507059e+37 }
 0x290   :  { %v1153_v13 = vpop.eup %1152 }
 0x291   :  { %v883_v14 = vmul.f32 %v1153_v13, %v873_v9  ;;  %vm888_vm1 = vweird.f32 %v1153_v13 }
 0x292   :  { %vm889_vm3 = vmor %vm887_vm2, %vm888_vm1 }
 0x293   :  { %v1155_v15 = vpop.eup %1154  ;;  %v884_v41 = vsub.f32 1.0, %v883_v14 }
 0x294   :  { %v898_v19 = vmul.f32 %v1155_v15, %v881_v12  ;;  %vm903_vm4 = vweird.f32 %v1155_v15 }
 0x295   :  { %v885_v17 = vmul.f32 %v1153_v13, %v884_v41  ;;  %vm904_vm7 = vmor %vm902_vm6, %vm903_vm4 }
 0x296   :  { %v899_v21 = vsub.f32 1.0, %v898_v19 }
 0x297   :  { %v886_v47 = vadd.f32 %v1153_v13, %v885_v17 }
 0x298   :  { %v900_v31 = vmul.f32 %v1155_v15, %v899_v21 }
 0x299   :  { %v890_v25 = vsel %vm889_vm3, %v1153_v13, %v886_v47 }
 0x29a   :  { %v895_v45 = vsel %vm892_vm5, %v894_v51, %v890_v25  ;;  %v901_v33 = vadd.f32 %v1155_v15, %v900_v31 }
 0x29b   :  { %v896_v35 = vmul.f32 %v1141_v59, %v895_v45  ;;  %v912_v46 = vmul.f32 %v1143_v60, %v895_v45  ;;  %v914_v44 = vmul.f32 %v1145_v54, %v895_v45 }
 0x29c   :  { %v905_v40 = vsel %vm904_vm7, %v1155_v15, %v901_v33 }
 0x29d   :  { %916 = vst [vmem:[#allocation2] sm:$0xff] %v896_v35  ;;  %v910_v38 = vsel %vm907_vm8, %v909_v63, %v905_v40 }
 0x29e   :  { %918 = vst [vmem:[#allocation2 + $0x10] sm:$0xff] %v912_v46  ;;  %v911_v42 = vmul.f32 %v1147_v34, %v910_v38  ;;  %v913_v36 = vmul.f32 %v1149_v55, %v910_v38  ;;  %v915_v39 = vmul.f32 %v1151_v28, %v910_v38 }
 0x29f   :  { %920 = vst [vmem:[#allocation2 + $0x20] sm:$0xff] %v914_v44 }
 0x2a0   :  { %917 = vst [vmem:[#allocation2 + $0x8] sm:$0xff] %v911_v42 }
 0x2a1   :  { %919 = vst [vmem:[#allocation2 + $0x18] sm:$0xff] %v913_v36 }
 0x2a2   :  { %921 = vst [vmem:[#allocation2 + $0x28] sm:$0xff] %v915_v39 }
 0x2a3   :  { %934 = dma.vmem_to_hbm [thread:$0]  %s927_s16, 768, %s929_s19, [#allocation3], %s1186_s20, %s1186_s20, %s1187_s2  }
 0x2a4   :  { %1180 = dma.done.wait [#allocation3], 768  }
 0x2a5   :  { %1181 = vsyncadd [#allocation3], 4294966528 }
 0x2a6   :  { %939 = vsyncpa [#allocation3], 1 }

</bundles_post_ra>
